<compile_context>
chip_gen: v6e
topology: v6e:2x2x1
jax: 0.10.0
libtpu: 0.0.40
codegen_flags: <defaults>
</compile_context>

<pallas_src>
import functools

import jax
import jax.numpy as jnp
import numpy as np
from jax.experimental import pallas as pl
from jax.experimental.pallas import tpu as pltpu


# ---------------------------------------------------------------------------
# Pallas kernel: fused depthwise k x k conv ("same" padding) + q * conv(v),
# for one (H, W, c_blk) lane-dense slab per grid step.
# ---------------------------------------------------------------------------
def _make_kernel(H, W, k, p):
    def kernel(x_ref, q_ref, w_ref, b_ref, o_ref, xp_ref):
        # x_ref : (H, W, Cb)         v slab (channels-last, lanes = B*h*Ch block)
        # q_ref : (H, W, Cb)
        # w_ref : (k*k, Cb)          per-lane depthwise weights, row = ky*k + kx
        # b_ref : (1, Cb)            per-lane bias
        # o_ref : (H, W, Cb)
        # xp_ref: (H + 2p, W, Cb)    f32 scratch, zero rows at top/bottom
        Cb = o_ref.shape[-1]
        f32 = jnp.float32

        # Build a row-padded (H boundary) f32 copy of x once in VMEM scratch.
        if p > 0:
            xp_ref[0:p] = jnp.zeros((p, W, Cb), f32)
            xp_ref[p + H:] = jnp.zeros((p, W, Cb), f32)
        xp_ref[p:p + H] = x_ref[...].astype(f32)
        xp = xp_ref[...]                                     # (H+2p, W, Cb)

        # Column index (for W-boundary masks folded into the weights).
        col = jax.lax.broadcasted_iota(jnp.int32, (W, Cb), 0)

        # Accumulator initialized with the bias.
        acc = jnp.broadcast_to(b_ref[...].astype(f32)[None], (H, W, Cb))

        # Unrolled k x k taps: one sublane roll per column offset (XLU),
        # then pure full-tile multiply-adds (VPU).
        for kx in range(k):
            dx = kx - p
            if dx == 0:
                xr = xp
                mask = None
            else:
                xr = pltpu.roll(xp, shift=(-dx) % W, axis=1)  # xr[:, ox] = xp[:, ox+dx]
                mask = ((col + dx >= 0) & (col + dx < W)).astype(f32)  # (W, Cb)
            for ky in range(k):
                t = ky * k + kx
                w_row = w_ref[t:t + 1, :].astype(f32)         # (1, Cb)
                w_eff = w_row if mask is None else w_row * mask
                # Rows [ky, ky+H) of the padded copy == input rows [oy+dy] (zero if OOB).
                acc = acc + xr[ky:ky + H] * w_eff

        o_ref[...] = (q_ref[...].astype(f32) * acc).astype(o_ref.dtype)

    return kernel


def _pick_c_block(H, W, k, C, itemsize, budget=24 << 20):
    """Largest lane-block (multiple of 128 dividing C) within a VMEM budget."""
    if C % 128 != 0:
        return C  # small / unaligned lane dim: take the full extent

    def est(cb):
        io = 2 * 3 * H * W * cb * itemsize            # double-buffered x, q, out
        scr = (H + 2 * (k // 2)) * W * cb * 4          # padded scratch
        tmp = 3 * H * W * cb * 4                       # acc / rolled temporaries
        wts = 2 * (k * k + 1) * cb * 4                 # weights + bias
        return io + scr + tmp + wts

    best = 128
    cb = 256
    while cb <= C:
        if C % cb == 0 and est(cb) <= budget:
            best = cb
        cb += 128
    return best


# ---------------------------------------------------------------------------
# ConvRelPosEnc forward (Pallas-backed).
# ---------------------------------------------------------------------------
def conv_rel_pos_enc(q, v, size, window, params):
    """
    q, v   : (B, h, N, Ch)
    size   : (H, W) with N == H * W
    window : int or dict {window_size: head_split}
    params : list of (weight (heads_g*Ch, 1, k, k), bias (heads_g*Ch,)) per split
    Returns (B, h, N, Ch)  ==  q * depthwise_conv(rearranged v)
    """
    B, h, N, Ch = q.shape
    H, W = size
    assert N == H * W
    if isinstance(window, int):
        window = {window: h}
    assert sum(window.values()) == h

    k_max = max(window.keys())
    p_max = k_max // 2

    # Per-(head, ch) weights, smaller windows zero-embedded into k_max x k_max
    # (extra taps multiply zero => identical "same"-padded output).
    w_chunks, b_chunks = [], []
    for (k_i, hg), (w_raw, b_raw) in zip(window.items(), params):
        C_i = hg * Ch
        w_i = w_raw.reshape(C_i, k_i, k_i)
        off = p_max - k_i // 2
        w_emb = jnp.zeros((C_i, k_max, k_max), w_raw.dtype)
        w_emb = w_emb.at[:, off:off + k_i, off:off + k_i].set(w_i)
        w_chunks.append(w_emb)
        b_chunks.append(b_raw.reshape(C_i))
    w_hc = jnp.concatenate(w_chunks, axis=0)          # (h*Ch, k, k)
    b_hc = jnp.concatenate(b_chunks, axis=0)          # (h*Ch,)

    C_lanes = B * h * Ch
    # Tile weights/bias over batch so the per-lane vector matches the folded lanes.
    w_full = (jnp.tile(w_hc, (B, 1, 1))               # (B*h*Ch, k, k)
                .transpose(1, 2, 0)                   # (k, k, B*h*Ch)
                .reshape(k_max * k_max, C_lanes))
    b_full = jnp.tile(b_hc, (B,)).reshape(1, C_lanes)

    # (B, h, N, Ch) -> (H, W, B*h*Ch): lane-dense channels-last slab.
    def to_slab(x):
        return (x.reshape(B, h, H, W, Ch)
                 .transpose(2, 3, 0, 1, 4)
                 .reshape(H, W, C_lanes))

    x_slab = to_slab(v)
    q_slab = to_slab(q)

    c_blk = _pick_c_block(H, W, k_max, C_lanes, q.dtype.itemsize)
    grid = (C_lanes // c_blk,)

    kernel = _make_kernel(H, W, k_max, p_max)
    out = pl.pallas_call(
        kernel,
        out_shape=jax.ShapeDtypeStruct((H, W, C_lanes), q.dtype),
        grid=grid,
        in_specs=[
            pl.BlockSpec((H, W, c_blk), lambda c: (0, 0, c)),
            pl.BlockSpec((H, W, c_blk), lambda c: (0, 0, c)),
            pl.BlockSpec((k_max * k_max, c_blk), lambda c: (0, c)),
            pl.BlockSpec((1, c_blk), lambda c: (0, c)),
        ],
        out_specs=pl.BlockSpec((H, W, c_blk), lambda c: (0, 0, c)),
        scratch_shapes=[pltpu.VMEM((H + 2 * p_max, W, c_blk), jnp.float32)],
        compiler_params=pltpu.CompilerParams(
            dimension_semantics=("parallel",),
            vmem_limit_bytes=48 * 1024 * 1024,
        ),
    )(x_slab, q_slab, w_full, b_full)

    # (H, W, B*h*Ch) -> (B, h, N, Ch)
    out = (out.reshape(H, W, B, h, Ch)
              .transpose(2, 3, 0, 1, 4)
              .reshape(B, h, N, Ch))
    # torch.cat with a zero-length tensor along dim=2 is a no-op.
    return out


# ---------------------------------------------------------------------------
# Pure-JAX reference (lax depthwise conv) for correctness checking.
# ---------------------------------------------------------------------------
def conv_rel_pos_enc_ref(q, v, size, window, params):
    B, h, N, Ch = q.shape
    H, W = size
    v_nchw = (v.reshape(B, h, H, W, Ch)
               .transpose(0, 1, 4, 2, 3)
               .reshape(B, h * Ch, H, W))
    outs = []
    c0 = 0
    for (k, hg), (w_raw, b_raw) in zip(window.items(), params):
        C = hg * Ch
        x = v_nchw[:, c0:c0 + C]
        p = k // 2
        y = jax.lax.conv_general_dilated(
            x, w_raw, window_strides=(1, 1), padding=((p, p), (p, p)),
            feature_group_count=C,
            dimension_numbers=("NCHW", "OIHW", "NCHW"))
        y = y + b_raw[None, :, None, None]
        outs.append(y)
        c0 += C
    conv_v = jnp.concatenate(outs, axis=1)                      # (B, h*Ch, H, W)
    conv_v = (conv_v.reshape(B, h, Ch, H, W)
                    .transpose(0, 1, 3, 4, 2)
                    .reshape(B, h, N, Ch))
    return q * conv_v


if __name__ == "__main__":
    # Module config: Ch channels/head, h heads, mixed windows (CoaT-style).
    Ch = 8
    h = 4
    window = {3: 2, 5: 2}          # {window_size: head_split}, sums to h
    B, H, W = 2, 8, 8
    N = H * W

    key = jax.random.PRNGKey(0)
    kq, kv, *kp = jax.random.split(key, 2 + 2 * len(window))

    q = jax.random.normal(kq, (B, h, N, Ch), dtype=jnp.float32)
    v = jax.random.normal(kv, (B, h, N, Ch), dtype=jnp.float32)

    # Deterministic synthetic conv parameters (shapes match nn.Conv2d depthwise).
    params = []
    for i, (k_sz, hg) in enumerate(window.items()):
        C = hg * Ch
        w = 0.1 * jax.random.normal(kp[2 * i], (C, 1, k_sz, k_sz), dtype=jnp.float32)
        b = 0.1 * jax.random.normal(kp[2 * i + 1], (C,), dtype=jnp.float32)
        params.append((w, b))

    fwd = jax.jit(functools.partial(conv_rel_pos_enc, size=(H, W),
                                    window=window, params=params))
    out = fwd(q, v)
    jax.block_until_ready(out)

    ref = conv_rel_pos_enc_ref(q, v, (H, W), window, params)
    np.testing.assert_allclose(np.asarray(out), np.asarray(ref),
                               rtol=1e-5, atol=1e-5)
    assert out.shape == (B, h, N, Ch)

    print("KERNEL_OK")
</pallas_src>

<mosaic_0001>
module attributes {stable_mosaic.version = 11 : i64} {
  func.func @kernel(%arg0: i32, %arg1: memref<8x8x64xf32, #tpu.memory_space<vmem>>, %arg2: memref<8x8x64xf32, #tpu.memory_space<vmem>>, %arg3: memref<25x64xf32, #tpu.memory_space<vmem>>, %arg4: memref<1x64xf32, #tpu.memory_space<vmem>>, %arg5: memref<8x8x64xf32, #tpu.memory_space<vmem>>, %arg6: memref<12x8x64xf32, #tpu.memory_space<vmem>>) attributes {dimension_semantics = [#tpu.dimension_semantics<parallel>], iteration_bounds = array<i64: 1>, scalar_prefetch = 0 : i64, scratch_operands = 1 : i64, tpu.core_type = #tpu.core_type<tc>, window_params = [{transform_indices = @transform_0, window_bounds = array<i64: 8, 8, 64>}, {transform_indices = @transform_1, window_bounds = array<i64: 8, 8, 64>}, {transform_indices = @transform_2, window_bounds = array<i64: 25, 64>}, {transform_indices = @transform_3, window_bounds = array<i64: 1, 64>}, {transform_indices = @transform_4, window_bounds = array<i64: 8, 8, 64>}]} {
    %cst = arith.constant 0.000000e+00 : f32
    %0 = vector.broadcast %cst : f32 to vector<2x8x64xf32>
    %c0 = arith.constant 0 : index
    %c0_0 = arith.constant 0 : index
    %c0_1 = arith.constant 0 : index
    %1 = vector.load %arg6[%c0, %c0_0, %c0_1] : memref<12x8x64xf32, #tpu.memory_space<vmem>>, vector<2x8x64xf32>
    tpu.vector_store %arg6[%c0, %c0_0, %c0_1], %0 {strides = array<i32>} : memref<12x8x64xf32, #tpu.memory_space<vmem>>, vector<2x8x64xf32>,
    %cst_2 = arith.constant 0.000000e+00 : f32
    %2 = vector.broadcast %cst_2 : f32 to vector<2x8x64xf32>
    %c10 = arith.constant 10 : index
    %c0_3 = arith.constant 0 : index
    %c0_4 = arith.constant 0 : index
    %3 = vector.load %arg6[%c10, %c0_3, %c0_4] : memref<12x8x64xf32, #tpu.memory_space<vmem>>, vector<2x8x64xf32>
    tpu.vector_store %arg6[%c10, %c0_3, %c0_4], %2 {strides = array<i32>} : memref<12x8x64xf32, #tpu.memory_space<vmem>>, vector<2x8x64xf32>,
    %c0_5 = arith.constant 0 : index
    %c0_6 = arith.constant 0 : index
    %c0_7 = arith.constant 0 : index
    %4 = vector.load %arg1[%c0_5, %c0_6, %c0_7] : memref<8x8x64xf32, #tpu.memory_space<vmem>>, vector<8x8x64xf32>
    %c2 = arith.constant 2 : index
    %c0_8 = arith.constant 0 : index
    %c0_9 = arith.constant 0 : index
    %5 = vector.load %arg6[%c2, %c0_8, %c0_9] : memref<12x8x64xf32, #tpu.memory_space<vmem>>, vector<8x8x64xf32>
    tpu.vector_store %arg6[%c2, %c0_8, %c0_9], %4 {strides = array<i32>} : memref<12x8x64xf32, #tpu.memory_space<vmem>>, vector<8x8x64xf32>,
    %c0_10 = arith.constant 0 : index
    %c0_11 = arith.constant 0 : index
    %c0_12 = arith.constant 0 : index
    %6 = vector.load %arg6[%c0_10, %c0_11, %c0_12] : memref<12x8x64xf32, #tpu.memory_space<vmem>>, vector<12x8x64xf32>
    %7 = tpu.iota {dimensions = array<i32: 0>} : vector<8x64xi32>
    %c0_13 = arith.constant 0 : index
    %c0_14 = arith.constant 0 : index
    %8 = vector.load %arg4[%c0_13, %c0_14] : memref<1x64xf32, #tpu.memory_space<vmem>>, vector<1x64xf32>
    %9 = vector.shape_cast %8 : vector<1x64xf32> to vector<1x1x64xf32>
    %10 = vector.shape_cast %9 : vector<1x1x64xf32> to vector<1x1x64xf32>
    %11 = vector.broadcast %10 : vector<1x1x64xf32> to vector<8x8x64xf32>
    %c2_i32 = arith.constant 2 : i32
    %12 = tpu.dynamic_rotate %6 by %c2_i32 dim 1 : vector<12x8x64xf32>, i32 -> vector<12x8x64xf32>
    %c-2_i32 = arith.constant -2 : i32
    %13 = vector.broadcast %c-2_i32 : i32 to vector<8x64xi32>
    %14 = arith.addi %7, %13 : vector<8x64xi32>
    %c0_i32 = arith.constant 0 : i32
    %15 = vector.broadcast %c0_i32 : i32 to vector<8x64xi32>
    %16 = arith.cmpi sge, %14, %15 : vector<8x64xi32>
    %c-2_i32_15 = arith.constant -2 : i32
    %17 = vector.broadcast %c-2_i32_15 : i32 to vector<8x64xi32>
    %18 = arith.addi %7, %17 : vector<8x64xi32>
    %c8_i32 = arith.constant 8 : i32
    %19 = vector.broadcast %c8_i32 : i32 to vector<8x64xi32>
    %20 = arith.cmpi slt, %18, %19 : vector<8x64xi32>
    %21 = arith.andi %16, %20 : vector<8x64xi1>
    %22 = arith.extui %21 : vector<8x64xi1> to vector<8x64xi32>
    %23 = arith.sitofp %22 : vector<8x64xi32> to vector<8x64xf32>
    %c0_16 = arith.constant 0 : index
    %c0_17 = arith.constant 0 : index
    %24 = vector.load %arg3[%c0_16, %c0_17] : memref<25x64xf32, #tpu.memory_space<vmem>>, vector<1x64xf32>
    %25 = vector.broadcast %24 : vector<1x64xf32> to vector<8x64xf32>
    %26 = arith.mulf %25, %23 : vector<8x64xf32>
    %27 = vector.extract_strided_slice %12 {offsets = [0, 0, 0], sizes = [8, 8, 64], strides = [1, 1, 1]} : vector<12x8x64xf32> to vector<8x8x64xf32>
    %28 = vector.shape_cast %26 : vector<8x64xf32> to vector<1x8x64xf32>
    %29 = vector.broadcast %28 : vector<1x8x64xf32> to vector<8x8x64xf32>
    %30 = arith.mulf %27, %29 : vector<8x8x64xf32>
    %31 = arith.addf %11, %30 : vector<8x8x64xf32>
    %c5 = arith.constant 5 : index
    %c0_18 = arith.constant 0 : index
    %32 = vector.load %arg3[%c5, %c0_18] : memref<25x64xf32, #tpu.memory_space<vmem>>, vector<1x64xf32>
    %33 = vector.broadcast %32 : vector<1x64xf32> to vector<8x64xf32>
    %34 = arith.mulf %33, %23 : vector<8x64xf32>
    %35 = vector.extract_strided_slice %12 {offsets = [1, 0, 0], sizes = [8, 8, 64], strides = [1, 1, 1]} : vector<12x8x64xf32> to vector<8x8x64xf32>
    %36 = vector.shape_cast %34 : vector<8x64xf32> to vector<1x8x64xf32>
    %37 = vector.broadcast %36 : vector<1x8x64xf32> to vector<8x8x64xf32>
    %38 = arith.mulf %35, %37 : vector<8x8x64xf32>
    %39 = arith.addf %31, %38 : vector<8x8x64xf32>
    %c10_19 = arith.constant 10 : index
    %c0_20 = arith.constant 0 : index
    %40 = vector.load %arg3[%c10_19, %c0_20] : memref<25x64xf32, #tpu.memory_space<vmem>>, vector<1x64xf32>
    %41 = vector.broadcast %40 : vector<1x64xf32> to vector<8x64xf32>
    %42 = arith.mulf %41, %23 : vector<8x64xf32>
    %43 = vector.extract_strided_slice %12 {offsets = [2, 0, 0], sizes = [8, 8, 64], strides = [1, 1, 1]} : vector<12x8x64xf32> to vector<8x8x64xf32>
    %44 = vector.shape_cast %42 : vector<8x64xf32> to vector<1x8x64xf32>
    %45 = vector.broadcast %44 : vector<1x8x64xf32> to vector<8x8x64xf32>
    %46 = arith.mulf %43, %45 : vector<8x8x64xf32>
    %47 = arith.addf %39, %46 : vector<8x8x64xf32>
    %c15 = arith.constant 15 : index
    %c0_21 = arith.constant 0 : index
    %48 = vector.load %arg3[%c15, %c0_21] : memref<25x64xf32, #tpu.memory_space<vmem>>, vector<1x64xf32>
    %49 = vector.broadcast %48 : vector<1x64xf32> to vector<8x64xf32>
    %50 = arith.mulf %49, %23 : vector<8x64xf32>
    %51 = vector.extract_strided_slice %12 {offsets = [3, 0, 0], sizes = [8, 8, 64], strides = [1, 1, 1]} : vector<12x8x64xf32> to vector<8x8x64xf32>
    %52 = vector.shape_cast %50 : vector<8x64xf32> to vector<1x8x64xf32>
    %53 = vector.broadcast %52 : vector<1x8x64xf32> to vector<8x8x64xf32>
    %54 = arith.mulf %51, %53 : vector<8x8x64xf32>
    %55 = arith.addf %47, %54 : vector<8x8x64xf32>
    %c20 = arith.constant 20 : index
    %c0_22 = arith.constant 0 : index
    %56 = vector.load %arg3[%c20, %c0_22] : memref<25x64xf32, #tpu.memory_space<vmem>>, vector<1x64xf32>
    %57 = vector.broadcast %56 : vector<1x64xf32> to vector<8x64xf32>
    %58 = arith.mulf %57, %23 : vector<8x64xf32>
    %59 = vector.extract_strided_slice %12 {offsets = [4, 0, 0], sizes = [8, 8, 64], strides = [1, 1, 1]} : vector<12x8x64xf32> to vector<8x8x64xf32>
    %60 = vector.shape_cast %58 : vector<8x64xf32> to vector<1x8x64xf32>
    %61 = vector.broadcast %60 : vector<1x8x64xf32> to vector<8x8x64xf32>
    %62 = arith.mulf %59, %61 : vector<8x8x64xf32>
    %63 = arith.addf %55, %62 : vector<8x8x64xf32>
    %c1_i32 = arith.constant 1 : i32
    %64 = tpu.dynamic_rotate %6 by %c1_i32 dim 1 : vector<12x8x64xf32>, i32 -> vector<12x8x64xf32>
    %c-1_i32 = arith.constant -1 : i32
    %65 = vector.broadcast %c-1_i32 : i32 to vector<8x64xi32>
    %66 = arith.addi %7, %65 : vector<8x64xi32>
    %c0_i32_23 = arith.constant 0 : i32
    %67 = vector.broadcast %c0_i32_23 : i32 to vector<8x64xi32>
    %68 = arith.cmpi sge, %66, %67 : vector<8x64xi32>
    %c-1_i32_24 = arith.constant -1 : i32
    %69 = vector.broadcast %c-1_i32_24 : i32 to vector<8x64xi32>
    %70 = arith.addi %7, %69 : vector<8x64xi32>
    %c8_i32_25 = arith.constant 8 : i32
    %71 = vector.broadcast %c8_i32_25 : i32 to vector<8x64xi32>
    %72 = arith.cmpi slt, %70, %71 : vector<8x64xi32>
    %73 = arith.andi %68, %72 : vector<8x64xi1>
    %74 = arith.extui %73 : vector<8x64xi1> to vector<8x64xi32>
    %75 = arith.sitofp %74 : vector<8x64xi32> to vector<8x64xf32>
    %c1 = arith.constant 1 : index
    %c0_26 = arith.constant 0 : index
    %76 = vector.load %arg3[%c1, %c0_26] : memref<25x64xf32, #tpu.memory_space<vmem>>, vector<1x64xf32>
    %77 = vector.broadcast %76 : vector<1x64xf32> to vector<8x64xf32>
    %78 = arith.mulf %77, %75 : vector<8x64xf32>
    %79 = vector.extract_strided_slice %64 {offsets = [0, 0, 0], sizes = [8, 8, 64], strides = [1, 1, 1]} : vector<12x8x64xf32> to vector<8x8x64xf32>
    %80 = vector.shape_cast %78 : vector<8x64xf32> to vector<1x8x64xf32>
    %81 = vector.broadcast %80 : vector<1x8x64xf32> to vector<8x8x64xf32>
    %82 = arith.mulf %79, %81 : vector<8x8x64xf32>
    %83 = arith.addf %63, %82 : vector<8x8x64xf32>
    %c6 = arith.constant 6 : index
    %c0_27 = arith.constant 0 : index
    %84 = vector.load %arg3[%c6, %c0_27] : memref<25x64xf32, #tpu.memory_space<vmem>>, vector<1x64xf32>
    %85 = vector.broadcast %84 : vector<1x64xf32> to vector<8x64xf32>
    %86 = arith.mulf %85, %75 : vector<8x64xf32>
    %87 = vector.extract_strided_slice %64 {offsets = [1, 0, 0], sizes = [8, 8, 64], strides = [1, 1, 1]} : vector<12x8x64xf32> to vector<8x8x64xf32>
    %88 = vector.shape_cast %86 : vector<8x64xf32> to vector<1x8x64xf32>
    %89 = vector.broadcast %88 : vector<1x8x64xf32> to vector<8x8x64xf32>
    %90 = arith.mulf %87, %89 : vector<8x8x64xf32>
    %91 = arith.addf %83, %90 : vector<8x8x64xf32>
    %c11 = arith.constant 11 : index
    %c0_28 = arith.constant 0 : index
    %92 = vector.load %arg3[%c11, %c0_28] : memref<25x64xf32, #tpu.memory_space<vmem>>, vector<1x64xf32>
    %93 = vector.broadcast %92 : vector<1x64xf32> to vector<8x64xf32>
    %94 = arith.mulf %93, %75 : vector<8x64xf32>
    %95 = vector.extract_strided_slice %64 {offsets = [2, 0, 0], sizes = [8, 8, 64], strides = [1, 1, 1]} : vector<12x8x64xf32> to vector<8x8x64xf32>
    %96 = vector.shape_cast %94 : vector<8x64xf32> to vector<1x8x64xf32>
    %97 = vector.broadcast %96 : vector<1x8x64xf32> to vector<8x8x64xf32>
    %98 = arith.mulf %95, %97 : vector<8x8x64xf32>
    %99 = arith.addf %91, %98 : vector<8x8x64xf32>
    %c16 = arith.constant 16 : index
    %c0_29 = arith.constant 0 : index
    %100 = vector.load %arg3[%c16, %c0_29] : memref<25x64xf32, #tpu.memory_space<vmem>>, vector<1x64xf32>
    %101 = vector.broadcast %100 : vector<1x64xf32> to vector<8x64xf32>
    %102 = arith.mulf %101, %75 : vector<8x64xf32>
    %103 = vector.extract_strided_slice %64 {offsets = [3, 0, 0], sizes = [8, 8, 64], strides = [1, 1, 1]} : vector<12x8x64xf32> to vector<8x8x64xf32>
    %104 = vector.shape_cast %102 : vector<8x64xf32> to vector<1x8x64xf32>
    %105 = vector.broadcast %104 : vector<1x8x64xf32> to vector<8x8x64xf32>
    %106 = arith.mulf %103, %105 : vector<8x8x64xf32>
    %107 = arith.addf %99, %106 : vector<8x8x64xf32>
    %c21 = arith.constant 21 : index
    %c0_30 = arith.constant 0 : index
    %108 = vector.load %arg3[%c21, %c0_30] : memref<25x64xf32, #tpu.memory_space<vmem>>, vector<1x64xf32>
    %109 = vector.broadcast %108 : vector<1x64xf32> to vector<8x64xf32>
    %110 = arith.mulf %109, %75 : vector<8x64xf32>
    %111 = vector.extract_strided_slice %64 {offsets = [4, 0, 0], sizes = [8, 8, 64], strides = [1, 1, 1]} : vector<12x8x64xf32> to vector<8x8x64xf32>
    %112 = vector.shape_cast %110 : vector<8x64xf32> to vector<1x8x64xf32>
    %113 = vector.broadcast %112 : vector<1x8x64xf32> to vector<8x8x64xf32>
    %114 = arith.mulf %111, %113 : vector<8x8x64xf32>
    %115 = arith.addf %107, %114 : vector<8x8x64xf32>
    %c2_31 = arith.constant 2 : index
    %c0_32 = arith.constant 0 : index
    %116 = vector.load %arg3[%c2_31, %c0_32] : memref<25x64xf32, #tpu.memory_space<vmem>>, vector<1x64xf32>
    %117 = vector.extract_strided_slice %6 {offsets = [0, 0, 0], sizes = [8, 8, 64], strides = [1, 1, 1]} : vector<12x8x64xf32> to vector<8x8x64xf32>
    %118 = vector.shape_cast %116 : vector<1x64xf32> to vector<1x1x64xf32>
    %119 = vector.broadcast %118 : vector<1x1x64xf32> to vector<8x8x64xf32>
    %120 = arith.mulf %117, %119 : vector<8x8x64xf32>
    %121 = arith.addf %115, %120 : vector<8x8x64xf32>
    %c7 = arith.constant 7 : index
    %c0_33 = arith.constant 0 : index
    %122 = vector.load %arg3[%c7, %c0_33] : memref<25x64xf32, #tpu.memory_space<vmem>>, vector<1x64xf32>
    %123 = vector.extract_strided_slice %6 {offsets = [1, 0, 0], sizes = [8, 8, 64], strides = [1, 1, 1]} : vector<12x8x64xf32> to vector<8x8x64xf32>
    %124 = vector.shape_cast %122 : vector<1x64xf32> to vector<1x1x64xf32>
    %125 = vector.broadcast %124 : vector<1x1x64xf32> to vector<8x8x64xf32>
    %126 = arith.mulf %123, %125 : vector<8x8x64xf32>
    %127 = arith.addf %121, %126 : vector<8x8x64xf32>
    %c12 = arith.constant 12 : index
    %c0_34 = arith.constant 0 : index
    %128 = vector.load %arg3[%c12, %c0_34] : memref<25x64xf32, #tpu.memory_space<vmem>>, vector<1x64xf32>
    %129 = vector.extract_strided_slice %6 {offsets = [2, 0, 0], sizes = [8, 8, 64], strides = [1, 1, 1]} : vector<12x8x64xf32> to vector<8x8x64xf32>
    %130 = vector.shape_cast %128 : vector<1x64xf32> to vector<1x1x64xf32>
    %131 = vector.broadcast %130 : vector<1x1x64xf32> to vector<8x8x64xf32>
    %132 = arith.mulf %129, %131 : vector<8x8x64xf32>
    %133 = arith.addf %127, %132 : vector<8x8x64xf32>
    %c17 = arith.constant 17 : index
    %c0_35 = arith.constant 0 : index
    %134 = vector.load %arg3[%c17, %c0_35] : memref<25x64xf32, #tpu.memory_space<vmem>>, vector<1x64xf32>
    %135 = vector.extract_strided_slice %6 {offsets = [3, 0, 0], sizes = [8, 8, 64], strides = [1, 1, 1]} : vector<12x8x64xf32> to vector<8x8x64xf32>
    %136 = vector.shape_cast %134 : vector<1x64xf32> to vector<1x1x64xf32>
    %137 = vector.broadcast %136 : vector<1x1x64xf32> to vector<8x8x64xf32>
    %138 = arith.mulf %135, %137 : vector<8x8x64xf32>
    %139 = arith.addf %133, %138 : vector<8x8x64xf32>
    %c22 = arith.constant 22 : index
    %c0_36 = arith.constant 0 : index
    %140 = vector.load %arg3[%c22, %c0_36] : memref<25x64xf32, #tpu.memory_space<vmem>>, vector<1x64xf32>
    %141 = vector.extract_strided_slice %6 {offsets = [4, 0, 0], sizes = [8, 8, 64], strides = [1, 1, 1]} : vector<12x8x64xf32> to vector<8x8x64xf32>
    %142 = vector.shape_cast %140 : vector<1x64xf32> to vector<1x1x64xf32>
    %143 = vector.broadcast %142 : vector<1x1x64xf32> to vector<8x8x64xf32>
    %144 = arith.mulf %141, %143 : vector<8x8x64xf32>
    %145 = arith.addf %139, %144 : vector<8x8x64xf32>
    %c7_i32 = arith.constant 7 : i32
    %146 = tpu.dynamic_rotate %6 by %c7_i32 dim 1 : vector<12x8x64xf32>, i32 -> vector<12x8x64xf32>
    %c1_i32_37 = arith.constant 1 : i32
    %147 = vector.broadcast %c1_i32_37 : i32 to vector<8x64xi32>
    %148 = arith.addi %7, %147 : vector<8x64xi32>
    %c0_i32_38 = arith.constant 0 : i32
    %149 = vector.broadcast %c0_i32_38 : i32 to vector<8x64xi32>
    %150 = arith.cmpi sge, %148, %149 : vector<8x64xi32>
    %c1_i32_39 = arith.constant 1 : i32
    %151 = vector.broadcast %c1_i32_39 : i32 to vector<8x64xi32>
    %152 = arith.addi %7, %151 : vector<8x64xi32>
    %c8_i32_40 = arith.constant 8 : i32
    %153 = vector.broadcast %c8_i32_40 : i32 to vector<8x64xi32>
    %154 = arith.cmpi slt, %152, %153 : vector<8x64xi32>
    %155 = arith.andi %150, %154 : vector<8x64xi1>
    %156 = arith.extui %155 : vector<8x64xi1> to vector<8x64xi32>
    %157 = arith.sitofp %156 : vector<8x64xi32> to vector<8x64xf32>
    %c3 = arith.constant 3 : index
    %c0_41 = arith.constant 0 : index
    %158 = vector.load %arg3[%c3, %c0_41] : memref<25x64xf32, #tpu.memory_space<vmem>>, vector<1x64xf32>
    %159 = vector.broadcast %158 : vector<1x64xf32> to vector<8x64xf32>
    %160 = arith.mulf %159, %157 : vector<8x64xf32>
    %161 = vector.extract_strided_slice %146 {offsets = [0, 0, 0], sizes = [8, 8, 64], strides = [1, 1, 1]} : vector<12x8x64xf32> to vector<8x8x64xf32>
    %162 = vector.shape_cast %160 : vector<8x64xf32> to vector<1x8x64xf32>
    %163 = vector.broadcast %162 : vector<1x8x64xf32> to vector<8x8x64xf32>
    %164 = arith.mulf %161, %163 : vector<8x8x64xf32>
    %165 = arith.addf %145, %164 : vector<8x8x64xf32>
    %c8 = arith.constant 8 : index
    %c0_42 = arith.constant 0 : index
    %166 = vector.load %arg3[%c8, %c0_42] : memref<25x64xf32, #tpu.memory_space<vmem>>, vector<1x64xf32>
    %167 = vector.broadcast %166 : vector<1x64xf32> to vector<8x64xf32>
    %168 = arith.mulf %167, %157 : vector<8x64xf32>
    %169 = vector.extract_strided_slice %146 {offsets = [1, 0, 0], sizes = [8, 8, 64], strides = [1, 1, 1]} : vector<12x8x64xf32> to vector<8x8x64xf32>
    %170 = vector.shape_cast %168 : vector<8x64xf32> to vector<1x8x64xf32>
    %171 = vector.broadcast %170 : vector<1x8x64xf32> to vector<8x8x64xf32>
    %172 = arith.mulf %169, %171 : vector<8x8x64xf32>
    %173 = arith.addf %165, %172 : vector<8x8x64xf32>
    %c13 = arith.constant 13 : index
    %c0_43 = arith.constant 0 : index
    %174 = vector.load %arg3[%c13, %c0_43] : memref<25x64xf32, #tpu.memory_space<vmem>>, vector<1x64xf32>
    %175 = vector.broadcast %174 : vector<1x64xf32> to vector<8x64xf32>
    %176 = arith.mulf %175, %157 : vector<8x64xf32>
    %177 = vector.extract_strided_slice %146 {offsets = [2, 0, 0], sizes = [8, 8, 64], strides = [1, 1, 1]} : vector<12x8x64xf32> to vector<8x8x64xf32>
    %178 = vector.shape_cast %176 : vector<8x64xf32> to vector<1x8x64xf32>
    %179 = vector.broadcast %178 : vector<1x8x64xf32> to vector<8x8x64xf32>
    %180 = arith.mulf %177, %179 : vector<8x8x64xf32>
    %181 = arith.addf %173, %180 : vector<8x8x64xf32>
    %c18 = arith.constant 18 : index
    %c0_44 = arith.constant 0 : index
    %182 = vector.load %arg3[%c18, %c0_44] : memref<25x64xf32, #tpu.memory_space<vmem>>, vector<1x64xf32>
    %183 = vector.broadcast %182 : vector<1x64xf32> to vector<8x64xf32>
    %184 = arith.mulf %183, %157 : vector<8x64xf32>
    %185 = vector.extract_strided_slice %146 {offsets = [3, 0, 0], sizes = [8, 8, 64], strides = [1, 1, 1]} : vector<12x8x64xf32> to vector<8x8x64xf32>
    %186 = vector.shape_cast %184 : vector<8x64xf32> to vector<1x8x64xf32>
    %187 = vector.broadcast %186 : vector<1x8x64xf32> to vector<8x8x64xf32>
    %188 = arith.mulf %185, %187 : vector<8x8x64xf32>
    %189 = arith.addf %181, %188 : vector<8x8x64xf32>
    %c23 = arith.constant 23 : index
    %c0_45 = arith.constant 0 : index
    %190 = vector.load %arg3[%c23, %c0_45] : memref<25x64xf32, #tpu.memory_space<vmem>>, vector<1x64xf32>
    %191 = vector.broadcast %190 : vector<1x64xf32> to vector<8x64xf32>
    %192 = arith.mulf %191, %157 : vector<8x64xf32>
    %193 = vector.extract_strided_slice %146 {offsets = [4, 0, 0], sizes = [8, 8, 64], strides = [1, 1, 1]} : vector<12x8x64xf32> to vector<8x8x64xf32>
    %194 = vector.shape_cast %192 : vector<8x64xf32> to vector<1x8x64xf32>
    %195 = vector.broadcast %194 : vector<1x8x64xf32> to vector<8x8x64xf32>
    %196 = arith.mulf %193, %195 : vector<8x8x64xf32>
    %197 = arith.addf %189, %196 : vector<8x8x64xf32>
    %c6_i32 = arith.constant 6 : i32
    %198 = tpu.dynamic_rotate %6 by %c6_i32 dim 1 : vector<12x8x64xf32>, i32 -> vector<12x8x64xf32>
    %c2_i32_46 = arith.constant 2 : i32
    %199 = vector.broadcast %c2_i32_46 : i32 to vector<8x64xi32>
    %200 = arith.addi %7, %199 : vector<8x64xi32>
    %c0_i32_47 = arith.constant 0 : i32
    %201 = vector.broadcast %c0_i32_47 : i32 to vector<8x64xi32>
    %202 = arith.cmpi sge, %200, %201 : vector<8x64xi32>
    %c2_i32_48 = arith.constant 2 : i32
    %203 = vector.broadcast %c2_i32_48 : i32 to vector<8x64xi32>
    %204 = arith.addi %7, %203 : vector<8x64xi32>
    %c8_i32_49 = arith.constant 8 : i32
    %205 = vector.broadcast %c8_i32_49 : i32 to vector<8x64xi32>
    %206 = arith.cmpi slt, %204, %205 : vector<8x64xi32>
    %207 = arith.andi %202, %206 : vector<8x64xi1>
    %208 = arith.extui %207 : vector<8x64xi1> to vector<8x64xi32>
    %209 = arith.sitofp %208 : vector<8x64xi32> to vector<8x64xf32>
    %c4 = arith.constant 4 : index
    %c0_50 = arith.constant 0 : index
    %210 = vector.load %arg3[%c4, %c0_50] : memref<25x64xf32, #tpu.memory_space<vmem>>, vector<1x64xf32>
    %211 = vector.broadcast %210 : vector<1x64xf32> to vector<8x64xf32>
    %212 = arith.mulf %211, %209 : vector<8x64xf32>
    %213 = vector.extract_strided_slice %198 {offsets = [0, 0, 0], sizes = [8, 8, 64], strides = [1, 1, 1]} : vector<12x8x64xf32> to vector<8x8x64xf32>
    %214 = vector.shape_cast %212 : vector<8x64xf32> to vector<1x8x64xf32>
    %215 = vector.broadcast %214 : vector<1x8x64xf32> to vector<8x8x64xf32>
    %216 = arith.mulf %213, %215 : vector<8x8x64xf32>
    %217 = arith.addf %197, %216 : vector<8x8x64xf32>
    %c9 = arith.constant 9 : index
    %c0_51 = arith.constant 0 : index
    %218 = vector.load %arg3[%c9, %c0_51] : memref<25x64xf32, #tpu.memory_space<vmem>>, vector<1x64xf32>
    %219 = vector.broadcast %218 : vector<1x64xf32> to vector<8x64xf32>
    %220 = arith.mulf %219, %209 : vector<8x64xf32>
    %221 = vector.extract_strided_slice %198 {offsets = [1, 0, 0], sizes = [8, 8, 64], strides = [1, 1, 1]} : vector<12x8x64xf32> to vector<8x8x64xf32>
    %222 = vector.shape_cast %220 : vector<8x64xf32> to vector<1x8x64xf32>
    %223 = vector.broadcast %222 : vector<1x8x64xf32> to vector<8x8x64xf32>
    %224 = arith.mulf %221, %223 : vector<8x8x64xf32>
    %225 = arith.addf %217, %224 : vector<8x8x64xf32>
    %c14 = arith.constant 14 : index
    %c0_52 = arith.constant 0 : index
    %226 = vector.load %arg3[%c14, %c0_52] : memref<25x64xf32, #tpu.memory_space<vmem>>, vector<1x64xf32>
    %227 = vector.broadcast %226 : vector<1x64xf32> to vector<8x64xf32>
    %228 = arith.mulf %227, %209 : vector<8x64xf32>
    %229 = vector.extract_strided_slice %198 {offsets = [2, 0, 0], sizes = [8, 8, 64], strides = [1, 1, 1]} : vector<12x8x64xf32> to vector<8x8x64xf32>
    %230 = vector.shape_cast %228 : vector<8x64xf32> to vector<1x8x64xf32>
    %231 = vector.broadcast %230 : vector<1x8x64xf32> to vector<8x8x64xf32>
    %232 = arith.mulf %229, %231 : vector<8x8x64xf32>
    %233 = arith.addf %225, %232 : vector<8x8x64xf32>
    %c19 = arith.constant 19 : index
    %c0_53 = arith.constant 0 : index
    %234 = vector.load %arg3[%c19, %c0_53] : memref<25x64xf32, #tpu.memory_space<vmem>>, vector<1x64xf32>
    %235 = vector.broadcast %234 : vector<1x64xf32> to vector<8x64xf32>
    %236 = arith.mulf %235, %209 : vector<8x64xf32>
    %237 = vector.extract_strided_slice %198 {offsets = [3, 0, 0], sizes = [8, 8, 64], strides = [1, 1, 1]} : vector<12x8x64xf32> to vector<8x8x64xf32>
    %238 = vector.shape_cast %236 : vector<8x64xf32> to vector<1x8x64xf32>
    %239 = vector.broadcast %238 : vector<1x8x64xf32> to vector<8x8x64xf32>
    %240 = arith.mulf %237, %239 : vector<8x8x64xf32>
    %241 = arith.addf %233, %240 : vector<8x8x64xf32>
    %c24 = arith.constant 24 : index
    %c0_54 = arith.constant 0 : index
    %242 = vector.load %arg3[%c24, %c0_54] : memref<25x64xf32, #tpu.memory_space<vmem>>, vector<1x64xf32>
    %243 = vector.broadcast %242 : vector<1x64xf32> to vector<8x64xf32>
    %244 = arith.mulf %243, %209 : vector<8x64xf32>
    %245 = vector.extract_strided_slice %198 {offsets = [4, 0, 0], sizes = [8, 8, 64], strides = [1, 1, 1]} : vector<12x8x64xf32> to vector<8x8x64xf32>
    %246 = vector.shape_cast %244 : vector<8x64xf32> to vector<1x8x64xf32>
    %247 = vector.broadcast %246 : vector<1x8x64xf32> to vector<8x8x64xf32>
    %248 = arith.mulf %245, %247 : vector<8x8x64xf32>
    %249 = arith.addf %241, %248 : vector<8x8x64xf32>
    %c0_55 = arith.constant 0 : index
    %c0_56 = arith.constant 0 : index
    %c0_57 = arith.constant 0 : index
    %250 = vector.load %arg2[%c0_55, %c0_56, %c0_57] : memref<8x8x64xf32, #tpu.memory_space<vmem>>, vector<8x8x64xf32>
    %251 = arith.mulf %250, %249 : vector<8x8x64xf32>
    %c0_58 = arith.constant 0 : index
    %c0_59 = arith.constant 0 : index
    %c0_60 = arith.constant 0 : index
    %252 = vector.load %arg5[%c0_58, %c0_59, %c0_60] : memref<8x8x64xf32, #tpu.memory_space<vmem>>, vector<8x8x64xf32>
    tpu.vector_store %arg5[%c0_58, %c0_59, %c0_60], %251 {strides = array<i32>} : memref<8x8x64xf32, #tpu.memory_space<vmem>>, vector<8x8x64xf32>,
    return
  }
  func.func @transform_0(%arg0: i32) -> (i32, i32, i32) {
    %c0_i32 = arith.constant 0 : i32
    %c0_i32_0 = arith.constant 0 : i32
    %c0_i32_1 = arith.constant 0 : i32
    return %c0_i32, %c0_i32_0, %arg0 : i32, i32, i32
  }
  func.func @transform_1(%arg0: i32) -> (i32, i32, i32) {
    %c0_i32 = arith.constant 0 : i32
    %c0_i32_0 = arith.constant 0 : i32
    %c0_i32_1 = arith.constant 0 : i32
    return %c0_i32, %c0_i32_0, %arg0 : i32, i32, i32
  }
  func.func @transform_2(%arg0: i32) -> (i32, i32) {
    %c0_i32 = arith.constant 0 : i32
    %c0_i32_0 = arith.constant 0 : i32
    return %c0_i32, %arg0 : i32, i32
  }
  func.func @transform_3(%arg0: i32) -> (i32, i32) {
    %c0_i32 = arith.constant 0 : i32
    %c0_i32_0 = arith.constant 0 : i32
    return %c0_i32, %arg0 : i32, i32
  }
  func.func @transform_4(%arg0: i32) -> (i32, i32, i32) {
    %c0_i32 = arith.constant 0 : i32
    %c0_i32_0 = arith.constant 0 : i32
    %c0_i32_1 = arith.constant 0 : i32
    return %c0_i32, %c0_i32_0, %arg0 : i32, i32, i32
  }
}

</mosaic_0001>

<bundles_post_ra>
// kernel: tile.13
= control target key start
LH: loop header
LB: loop body
LE: loop exit
PB: predicated region body
PF: predicated region fallthrough
CT: control target
= control target key end

     0   :  { %vm128_vm0 = vcmask 1047556   ;;  %vm130_vm1 = vcmask 261120   ;;  %vm179_vm2 = vcmask 1044484   ;;  %vm183_vm3 = vcmask 1047557   ;;  %s423_s0 = inlined_call_operand.vmem [shape: f32[2,32,5,5], index: 0, kind: input, shape index: {}]   ;;  %s424_s1 = inlined_call_operand.vmem [shape: f32[64,5,5], index: 1, kind: output, shape index: {}]  }
   0x1   :  { %v254_v0 = vld [vmem:[%s423_s0 + $0xe] sm:$0x3]  ;;  %v255_v1 = vld [vmem:[%s423_s0 + $0xc] sm:$0x3]  ;;  %v256_v2 = vld [vmem:[%s423_s0 + $0xa] sm:$0x3] }
   0x2   :  { %94 = vst [vmem:[#allocation0 + $0x38] sm:$0x3] %v254_v0  ;;  %99 = vst [vmem:[#allocation0 + $0x30] sm:$0x3] %v255_v1  ;;  %v257_v3 = vld [vmem:[%s423_s0 + $0x8] sm:$0x3] }
   0x3   :  { %104 = vst [vmem:[#allocation0 + $0x28] sm:$0x3] %v256_v2  ;;  %v258_v4 = vld [vmem:[%s423_s0 + $0x6] sm:$0x3]  ;;  %v259_v5 = vld [vmem:[%s423_s0 + $0x4] sm:$0x3] }
   0x4   :  { %109 = vst [vmem:[#allocation0 + $0x20] sm:$0x3] %v257_v3  ;;  %114 = vst [vmem:[#allocation0 + $0x18] sm:$0x3] %v258_v4  ;;  %v260_v6 = vld [vmem:[%s423_s0 + $0x2] sm:$0x3] }
   0x5   :  { %119 = vst [vmem:[#allocation0 + $0x10] sm:$0x3] %v259_v5  ;;  %v124_v7 = vld [vmem:[%s423_s0] sm:$0x3]  ;;  %123 = vst [vmem:[#allocation0 + $0x8] sm:$0x3] %v260_v6 }
   0x6   :  { %125 = vst [vmem:[#allocation0] sm:$0x3] %v124_v7  ;;  %v243_v8 = vld [vmem:[%s423_s0 + $0x24] sm:$0x3]  ;;  %v244_v9 = vld [vmem:[%s423_s0 + $0x22] sm:$0x3] }
   0x7   :  { %v245_v10 = vld [vmem:[%s423_s0 + $0x20] sm:$0x3]  ;;  %39 = vst [vmem:[#allocation0 + $0x90] sm:$0x3] %v243_v8  ;;  %44 = vst [vmem:[#allocation0 + $0x88] sm:$0x3] %v244_v9 }
   0x8   :  { %49 = vst [vmem:[#allocation0 + $0x80] sm:$0x3] %v245_v10  ;;  %v246_v11 = vld [vmem:[%s423_s0 + $0x1e] sm:$0x3]  ;;  %v247_v12 = vld [vmem:[%s423_s0 + $0x1c] sm:$0x3] }
   0x9   :  { %v248_v13 = vld [vmem:[%s423_s0 + $0x1a] sm:$0x3]  ;;  %54 = vst [vmem:[#allocation0 + $0x78] sm:$0x3] %v246_v11  ;;  %59 = vst [vmem:[#allocation0 + $0x70] sm:$0x3] %v247_v12 }
   0xa   :  { %64 = vst [vmem:[#allocation0 + $0x68] sm:$0x3] %v248_v13  ;;  %v249_v14 = vld [vmem:[%s423_s0 + $0x18] sm:$0x3]  ;;  %v250_v15 = vld [vmem:[%s423_s0 + $0x16] sm:$0x3] }
   0xb   :  { %v242_v16 = vld [vmem:[%s423_s0 + $0x26] sm:$0x3]  ;;  %69 = vst [vmem:[#allocation0 + $0x60] sm:$0x3] %v249_v14  ;;  %74 = vst [vmem:[#allocation0 + $0x58] sm:$0x3] %v250_v15 }
   0xc   :  { %34 = vst [vmem:[#allocation0 + $0x98] sm:$0x3] %v242_v16  ;;  %v237_v17 = vld [vmem:[%s423_s0 + $0x30] sm:$0x3]  ;;  %v238_v18 = vld [vmem:[%s423_s0 + $0x2e] sm:$0x3] }
   0xd   :  { %v239_v19 = vld [vmem:[%s423_s0 + $0x2c] sm:$0x3]  ;;  %9 = vst [vmem:[#allocation0 + $0xc0] sm:$0x3] %v237_v17  ;;  %14 = vst [vmem:[#allocation0 + $0xb8] sm:$0x3] %v238_v18 }
   0xe   :  { %19 = vst [vmem:[#allocation0 + $0xb0] sm:$0x3] %v239_v19  ;;  %v240_v20 = vld [vmem:[%s423_s0 + $0x2a] sm:$0x3]  ;;  %v241_v21 = vld [vmem:[%s423_s0 + $0x28] sm:$0x3] }
   0xf   :  { %v251_v22 = vld [vmem:[%s423_s0 + $0x14] sm:$0x3]  ;;  %24 = vst [vmem:[#allocation0 + $0xa8] sm:$0x3] %v240_v20  ;;  %29 = vst [vmem:[#allocation0 + $0xa0] sm:$0x3] %v241_v21 }
  0x10   :  { %79 = vst [vmem:[#allocation0 + $0x50] sm:$0x3] %v251_v22  ;;  %v252_v23 = vld [vmem:[%s423_s0 + $0x12] sm:$0x3]  ;;  %v253_v24 = vld [vmem:[%s423_s0 + $0x10] sm:$0x3] }
  0x11   :  { %v166_v25 = vld [vmem:[#allocation0 + $0x1] ss:$8 sm:$0xf0]   ;;  %84 = vst [vmem:[#allocation0 + $0x48] sm:$0x3] %v252_v23  ;;  %s276_s0 = smov 32  }
  0x12   :  { %89 = vst [vmem:[#allocation0 + $0x40] sm:$0x3] %v253_v24  ;;  %v164_v26 = vld [vmem:[#allocation0 + $0x1] ss:$8 sm:$0xf]   ;;  %vm171_vm4 = vcmask 523520  }
  0x13   :  { %v126_v27 = vld [vmem:[#allocation0] ss:$8 sm:$0xf]   ;;  %v168_v28 = vsel %vm128_vm0, %v166_v25, %v164_v26  ;;  %v197_v30 = vld [vmem:[#allocation0 + $0x59] ss:$8 sm:$0xf0]  }
  0x14   :  { %v127_v29 = vld [vmem:[#allocation0] ss:$8 sm:$0xf0]   ;;  %169 = vrot.lane.b32.xlu0 %v168_v28, %s276_s0  ;;  %v195_v32 = vld [vmem:[#allocation0 + $0x59] ss:$8 sm:$0xf]  }
  0x15   :  { %v129_v31 = vsel %vm128_vm0, %v127_v29, %v126_v27  ;;  %v199_v33 = vsel %vm128_vm0, %v197_v30, %v195_v32  ;;  %v208_v34 = vld [vmem:[#allocation0 + $0x99] sm:$0x1]   ;;  %v178_v35 = vld [vmem:[#allocation0 + $0xbd] sm:$0x10]   ;;  %v159_v45 = vld [vmem:[#allocation0 + $0xc0] sm:$0x1]  }
  0x16   :  { %131 = vst.msk [vmem:[%s424_s1] sm:$0x1f] %vm130_vm1, %v129_v31   ;;  %261 = vst.msk [vmem:[%s424_s1 + $0x3] sm:$0xe0] %vm130_vm1, %v129_v31   ;;  %200 = vrot.lane.b32.xlu1 %v199_v33, %s276_s0 }
  0x17   :  { %v137_v36 = vld [vmem:[#allocation0 + $0x40] ss:$8 sm:$0xf0]   ;;  %v176_v37 = vld [vmem:[#allocation0 + $0xa1] ss:$8 sm:$0xf]  }
  0x18   :  { %v148_v38 = vld [vmem:[#allocation0 + $0x80] ss:$8 sm:$0xf]   ;;  %v180_v39 = vsel %vm179_vm2, %v178_v35, %v176_v37  ;;  %267 = vst.msk [vmem:[%s424_s1 + $0x24] sm:$0x1] %vm130_vm1, %v159_v45  }
  0x19   :  { %v182_v40 = vld [vmem:[#allocation0 + $0x19] ss:$8 sm:$0xe0]   ;;  %v135_v41 = vld [vmem:[#allocation0 + $0x40] ss:$8 sm:$0xf]  }
  0x1a   :  { %v184_v42 = vsel %vm183_vm3, %v182_v40, %v180_v39  ;;  %v139_v43 = vsel %vm128_vm0, %v137_v36, %v135_v41  ;;  %v150_v44 = vld [vmem:[#allocation0 + $0x80] ss:$8 sm:$0xf0]   ;;  %209 = vrot.lane.b32.xlu1 %v208_v34, %s276_s0 }
  0x1b   :  { %185 = vrot.lane.b32.xlu0 %v184_v42, %s276_s0  ;;  %263 = vst.msk [vmem:[%s424_s1 + $0xe] sm:$0x7c] %vm130_vm1, %v139_v43   ;;  %264 = vst.msk [vmem:[%s424_s1 + $0x11] sm:$0x80] %vm130_vm1, %v139_v43   ;;  %v152_v46 = vsel %vm128_vm0, %v150_v44, %v148_v38 }
  0x1c   :  { %262 = vst.msk [vmem:[%s424_s1 + $0xb] sm:$0x3] %vm130_vm1, %v139_v43   ;;  %265 = vst.msk [vmem:[%s424_s1 + $0x19] sm:$0xf] %vm130_vm1, %v152_v46  }
  0x1d   :  { %266 = vst.msk [vmem:[%s424_s1 + $0x1c] sm:$0xf0] %vm130_vm1, %v152_v46  }
  0x86   :  { %v170_v47 = vpop.permute.xlu0 %169  }
  0x87   :  { %172 = vst.msk [vmem:[%s424_s1] sm:$0x1f] %vm171_vm4, %v170_v47   ;;  %268 = vst.msk [vmem:[%s424_s1 + $0x3] sm:$0xe0] %vm171_vm4, %v170_v47  }
  0x88   :  { %v201_v48 = vpop.permute.xlu1 %200  }
  0x89   :  { %272 = vst.msk [vmem:[%s424_s1 + $0x11] sm:$0xf] %vm171_vm4, %v201_v48   ;;  %273 = vst.msk [vmem:[%s424_s1 + $0x14] sm:$0xf0] %vm171_vm4, %v201_v48  }
  0x8c   :  { %v210_v50 = vpop.permute.xlu1 %209  }
  0x8d   :  { %v186_v49 = vpop.permute.xlu0 %185   ;;  %274 = vst.msk [vmem:[%s424_s1 + $0x1c] sm:$0x1] %vm171_vm4, %v210_v50  }
  0x8e   :  { %269 = vst.msk [vmem:[%s424_s1 + $0x20] sm:$0x1f] %vm171_vm4, %v186_v49   ;;  %270 = vst.msk [vmem:[%s424_s1 + $0x6] sm:$0x60] %vm171_vm4, %v186_v49  }
  0x8f   :  { %271 = vst.msk [vmem:[%s424_s1 + $0x9] sm:$0x80] %vm171_vm4, %v186_v49  }

// kernel: tile.17
= control target key start
LH: loop header
LB: loop body
LE: loop exit
PB: predicated region body
PF: predicated region fallthrough
CT: control target
= control target key end

     0   :  { %vm8_vm0 = vcmask 261120   ;;  %vm14_vm1 = vcmask 523520   ;;  %s42_s0 = inlined_call_operand.vmem [shape: f32[2,32], index: 0, kind: input, shape index: {}]   ;;  %s43_s1 = inlined_call_operand.vmem [shape: f32[1,64], index: 1, kind: output, shape index: {}]  }
   0x1   :  { %v5_v0 = vld [vmem:[%s42_s0] sm:$0x3]  ;;  %s25_s0 = smov 32  }
   0x2   :  { %6 = vst [vmem:[#allocation1] sm:$0x3] %v5_v0 }
   0x9   :  { %v11_v1 = vld [vmem:[#allocation1 + $0x1] sm:$0x1]   ;;  %v7_v2 = vld [vmem:[#allocation1] sm:$0x1]  }
   0xa   :  { %12 = vrot.lane.b32.xlu0 %v11_v1, %s25_s0  ;;  %9 = vst.msk [vmem:[#allocation0] sm:$0x1] %vm8_vm0, %v7_v2  }
  0x7c   :  { %v13_v3 = vpop.permute.xlu0 %12  }
  0x7d   :  { %15 = vst.msk [vmem:[#allocation0] sm:$0x1] %vm14_vm1, %v13_v3  }
  0x84   :  { %v20_v4 = vld [vmem:[#allocation0] sm:$0x1] }
  0x85   :  { %23 = vst [vmem:[%s43_s1] sm:$0x1] %v20_v4 }

// kernel: tile.16
= control target key start
LH: loop header
LB: loop body
LE: loop exit
PB: predicated region body
PF: predicated region fallthrough
CT: control target
= control target key end

     0   :  { %s22_s0 = inlined_call_operand.vmem [shape: f32[32], index: 0, kind: input, shape index: {}]   ;;  %s23_s1 = inlined_call_operand.vmem [shape: f32[2,32], index: 1, kind: output, shape index: {}]  }
   0x1   :  { %v4_v0 = vld [vmem:[%s22_s0] ss:$0 sm:$0xff] }
   0x2   :  { %5 = vst [vmem:[%s23_s1] sm:$0x3] %v4_v0 }

// kernel: conv_rel_pos_enc.1
= control target key start
LH: loop header
LB: loop body
LE: loop exit
PB: predicated region body
PF: predicated region fallthrough
CT: control target
= control target key end

     0   :  { %vm17_vm0 = vcmask 523264   ;;  %v52_v0 = vlaneseq  ;;  %v737_v1 = vmov 0.0   ;;  %s1516_s0 = inlined_call_operand.vmem [shape: f32[8,8,64], index: 0, kind: input, shape index: {}]   ;;  %s1517_s2 = inlined_call_operand.vmem [shape: f32[25,64], index: 2, kind: input, shape index: {}]   ;;  %s1518_s3 = inlined_call_operand.vmem [shape: f32[1,64], index: 3, kind: input, shape index: {}]   ;;  %s1519_s1 = inlined_call_operand.vmem [shape: f32[8,8,64], index: 1, kind: input, shape index: {}]   ;;  %s1520_s4 = inlined_call_operand.vmem [shape: f32[8,8,64], index: 4, kind: output, shape index: {}]  }
   0x1   :  { %18 = vst.msk [vmem:[#allocation2] sm:$0xff] %vm17_vm0, %v737_v1  ;;  %19 = vst.msk [vmem:[#allocation2 + $0x8] sm:$0xff] %vm17_vm0, %v737_v1  ;;  %v23_v3 = vld [vmem:[%s1516_s0] sm:$0xff]  ;;  %v24_v9 = vld [vmem:[%s1516_s0 + $0x8] sm:$0xff] }
   0x2   :  { %21 = vst.msk [vmem:[#allocation2 + $0x50] sm:$0xff] %vm17_vm0, %v737_v1  ;;  %22 = vst.msk [vmem:[#allocation2 + $0x58] sm:$0xff] %vm17_vm0, %v737_v1  ;;  %v53_v2 = vshrl.u32 %v52_v0, 7  ;;  %v708_v6 = vld [vmem:[%s1517_s2] ss:$0 sm:$0xff]  ;;  %v25_v11 = vld [vmem:[%s1516_s0 + $0x10] sm:$0xff] }
   0x3   :  { %32 = vst.msk [vmem:[#allocation2 + $0x10] sm:$0xff] %vm17_vm0, %v23_v3  ;;  %v709_v7 = vld [vmem:[%s1517_s2 + $0x5] ss:$0 sm:$0xff]  ;;  %v710_v10 = vld [vmem:[%s1517_s2 + $0xa] ss:$0 sm:$0xff]  ;;  %33 = vst.msk [vmem:[#allocation2 + $0x18] sm:$0xff] %vm17_vm0, %v24_v9 }
   0x4   :  { %v73_v4 = vadd.s32 4294967294, %v53_v2  ;;  %v201_v8 = vadd.s32 4294967295, %v53_v2  ;;  %v26_v12 = vld [vmem:[%s1516_s0 + $0x18] sm:$0xff]  ;;  %v27_v13 = vld [vmem:[%s1516_s0 + $0x20] sm:$0xff]  ;;  %34 = vst.msk [vmem:[#allocation2 + $0x20] sm:$0xff] %vm17_vm0, %v25_v11  ;;  %v28_v16 = vld [vmem:[%s1516_s0 + $0x28] sm:$0xff] }
   0x5   :  { %35 = vst.msk [vmem:[#allocation2 + $0x28] sm:$0xff] %vm17_vm0, %v26_v12  ;;  %36 = vst.msk [vmem:[#allocation2 + $0x30] sm:$0xff] %vm17_vm0, %v27_v13  ;;  %v29_v17 = vld [vmem:[%s1516_s0 + $0x30] sm:$0xff]  ;;  %v30_v18 = vld [vmem:[%s1516_s0 + $0x38] sm:$0xff]  ;;  %v434_v25 = vadd.s32 1, %v53_v2  ;;  %v562_v40 = vadd.s32 2, %v53_v2 }
   0x6   :  { %vm74_vm1 = vcmp.ge.s32.totalorder %v73_v4, 0  ;;  %37 = vst.msk [vmem:[#allocation2 + $0x38] sm:$0xff] %vm17_vm0, %v28_v16  ;;  %38 = vst.msk [vmem:[#allocation2 + $0x40] sm:$0xff] %vm17_vm0, %v29_v17  ;;  %vm202_vm2 = vcmp.ge.s32.totalorder %v201_v8, 0  ;;  %v711_v24 = vld [vmem:[%s1517_s2 + $0xf] ss:$0 sm:$0xff] }
   0x7   :  { %v707_v5 = vsel %vm74_vm1, 1.0, %v737_v1  ;;  %39 = vst.msk [vmem:[#allocation2 + $0x48] sm:$0xff] %vm17_vm0, %v30_v18  ;;  %v831_v26 = vld [vmem:[%s1518_s3] ss:$0 sm:$0xff]  ;;  %v712_v32 = vld [vmem:[%s1517_s2 + $0x14] ss:$0 sm:$0xff] }
   0x8   :  { %v798_v14 = vmul.f32 %v708_v6, %v707_v5  ;;  %v800_v15 = vmul.f32 %v709_v7, %v707_v5  ;;  %v817_v19 = vld [vmem:[#allocation2] sm:$0xff]  ;;  %v819_v20 = vld [vmem:[#allocation2 + $0x8] sm:$0xff]  ;;  %1568 = vst [vmem:[#allocation5_spill] sm:$0xff] %v831_v26  ;;  %v836_v28 = vmul.f32 %v710_v10, %v707_v5  ;;  %v713_v33 = vsel %vm202_vm2, 1.0, %v737_v1  ;;  %v717_v53 = vld [vmem:[%s1517_s2 + $0x10] ss:$0 sm:$0xff] }
   0x9   :  { %v61_v22 = vrot.slane %v817_v19, 6  ;;  %v62_v23 = vrot.slane %v819_v20, 6  ;;  %v845_v34 = vmul.f32 %v711_v24, %v707_v5  ;;  %v714_v35 = vld [vmem:[%s1517_s2 + $0x1] ss:$0 sm:$0xff]  ;;  %vm436_vm3 = vcmp.lt.s32.totalorder %v434_v25, 8 }
   0xa   :  { %1566 = vst [vmem:[#allocation3_spill] sm:$0xff] %v798_v14  ;;  %1567 = vst [vmem:[#allocation4_spill] sm:$0xff] %v800_v15  ;;  %v821_v21 = vld [vmem:[#allocation2 + $0x10] sm:$0xff]  ;;  %v850_v36 = vld [vmem:[#allocation2 + $0x18] sm:$0xff]  ;;  %v863_v44 = vmul.f32 %v712_v32, %v707_v5  ;;  %v873_v49 = vmul.f32 %v714_v35, %v713_v33  ;;  %v189_v51 = vrot.slane %v817_v19, 7  ;;  %v724_v60 = vsel %vm436_vm3, 1.0, %v737_v1 }
   0xb   :  { %v834_v27 = vrot.slane %v821_v21, 6  ;;  %v85_v29 = vmul.f32 %v798_v14, %v61_v22  ;;  %v86_v30 = vmul.f32 %v798_v14, %v62_v23  ;;  %v107_v31 = vmul.f32 %v800_v15, %v62_v23  ;;  %v859_v42 = vld [vmem:[#allocation2 + $0x20] sm:$0xff]  ;;  %v716_v52 = vld [vmem:[%s1517_s2 + $0xb] ss:$0 sm:$0xff]  ;;  %v718_v54 = vld [vmem:[%s1517_s2 + $0x15] ss:$0 sm:$0xff] }
   0xc   :  { %v857_v41 = vrot.slane %v850_v36, 6  ;;  %v861_v43 = vld [vmem:[#allocation2 + $0x28] sm:$0xff]  ;;  %v715_v45 = vld [vmem:[%s1517_s2 + $0x6] ss:$0 sm:$0xff]  ;;  %v869_v46 = vrot.slane %v859_v42, 6  ;;  %1569 = vst [vmem:[#allocation6_spill] sm:$0xff] %v873_v49  ;;  %v907_v5 = vmul.f32 %v716_v52, %v713_v33  ;;  %v909_v6 = vmul.f32 %v717_v53, %v713_v33 }
   0xd   :  { %v93_v37 = vadd.f32 %v831_v26, %v85_v29  ;;  %v94_v38 = vadd.f32 %v831_v26, %v86_v30  ;;  %v108_v39 = vmul.f32 %v800_v15, %v834_v27  ;;  %v129_v48 = vmul.f32 %v836_v28, %v834_v27  ;;  %v725_v62 = vld [vmem:[%s1517_s2 + $0x3] ss:$0 sm:$0xff]  ;;  %v726_v63 = vld [vmem:[%s1517_s2 + $0x8] ss:$0 sm:$0xff]  ;;  %v727_v9 = vld [vmem:[%s1517_s2 + $0xd] ss:$0 sm:$0xff] }
   0xe   :  { %v876_v50 = vrot.slane %v861_v43, 6  ;;  %v130_v56 = vmul.f32 %v836_v28, %v857_v41  ;;  %v151_v58 = vmul.f32 %v845_v34, %v857_v41  ;;  %v892_v59 = vmul.f32 %v715_v45, %v713_v33  ;;  %1570 = vst [vmem:[#allocation7_spill] sm:$0xff] %v909_v6  ;;  %v728_v10 = vld [vmem:[%s1517_s2 + $0x12] ss:$0 sm:$0xff]  ;;  %v729_v22 = vld [vmem:[%s1517_s2 + $0x17] ss:$0 sm:$0xff] }
   0xf   :  { %v115_v47 = vadd.f32 %v107_v31, %v93_v37  ;;  %v116_v55 = vadd.f32 %v108_v39, %v94_v38  ;;  %vm564_vm4 = vcmp.lt.s32.totalorder %v562_v40, 8  ;;  %v190_v61 = vrot.slane %v819_v20, 7  ;;  %v731_v24 = vld [vmem:[%s1517_s2 + $0x4] ss:$0 sm:$0xff]  ;;  %v732_v29 = vld [vmem:[%s1517_s2 + $0x9] ss:$0 sm:$0xff] }
  0x10   :  { %v152_v2 = vmul.f32 %v845_v34, %v869_v46  ;;  %v173_v4 = vmul.f32 %v863_v44, %v869_v46  ;;  %v911_v7 = vmul.f32 %v718_v54, %v713_v33  ;;  %v191_v8 = vrot.slane %v821_v21, 7  ;;  %v733_v30 = vld [vmem:[%s1517_s2 + $0xe] ss:$0 sm:$0xff]  ;;  %v734_v38 = vld [vmem:[%s1517_s2 + $0x13] ss:$0 sm:$0xff] }
  0x11   :  { %v137_v57 = vadd.f32 %v129_v48, %v115_v47  ;;  %v138_v0 = vadd.f32 %v130_v56, %v116_v55  ;;  %v174_v12 = vmul.f32 %v863_v44, %v876_v50  ;;  %v213_v16 = vmul.f32 %v873_v49, %v189_v51  ;;  %v735_v45 = vld [vmem:[%s1517_s2 + $0x18] ss:$0 sm:$0xff]  ;;  %v966_v53 = vld [vmem:[%s1517_s2 + $0x2] ss:$0 sm:$0xff] }
  0x12   :  { %1571 = vst [vmem:[#allocation8_spill] sm:$0xff] %v911_v7  ;;  %v923_v17 = vmul.f32 %v725_v62, %v724_v60  ;;  %v925_v18 = vmul.f32 %v726_v63, %v724_v60  ;;  %v730_v23 = vsel %vm564_vm4, 1.0, %v737_v1  ;;  %v214_v25 = vmul.f32 %v873_v49, %v190_v61  ;;  %1576 = vst [vmem:[#allocation13_spill] sm:$0xff] %v966_v53 }
  0x13   :  { %v159_v3 = vadd.f32 %v151_v58, %v137_v57  ;;  %v160_v11 = vadd.f32 %v152_v2, %v138_v0  ;;  %v943_v32 = vrot.slane %v850_v36, 7  ;;  %v235_v1 = vmul.f32 %v892_v59, %v190_v61  ;;  %v978_v58 = vld [vmem:[#allocation2 + $0x30] sm:$0xff]  ;;  %v980_v61 = vld [vmem:[#allocation2 + $0x38] sm:$0xff] }
  0x14   :  { %1572 = vst [vmem:[#allocation9_spill] sm:$0xff] %v923_v17  ;;  %1573 = vst [vmem:[#allocation10_spill] sm:$0xff] %v925_v18  ;;  %v946_v35 = vmul.f32 %v727_v9, %v724_v60  ;;  %v948_v37 = vmul.f32 %v728_v10, %v724_v60  ;;  %v87_v39 = vmul.f32 %v798_v14, %v834_v27  ;;  %v956_v40 = vrot.slane %v859_v42, 7 }
  0x15   :  { %v181_v13 = vadd.f32 %v173_v4, %v159_v3  ;;  %v182_v31 = vadd.f32 %v174_v12, %v160_v11  ;;  %v236_v48 = vmul.f32 %v892_v59, %v191_v8  ;;  %v257_v52 = vmul.f32 %v907_v5, %v191_v8  ;;  %1579 = vst [vmem:[#allocation16_spill] sm:$0xff] %v980_v61 }
  0x16   :  { %1574 = vst [vmem:[#allocation11_spill] sm:$0xff] %v946_v35  ;;  %1575 = vst [vmem:[#allocation12_spill] sm:$0xff] %v948_v37  ;;  %v968_v54 = vmul.f32 %v729_v22, %v724_v60  ;;  %v970_v27 = vmul.f32 %v731_v24, %v730_v23  ;;  %v972_v55 = vmul.f32 %v732_v29, %v730_v23  ;;  %v986_v60 = vld [vmem:[#allocation2 + $0x40] sm:$0xff]  ;;  %v997_v12 = vrot.slane %v861_v43, 7 }
  0x17   :  { %v221_v33 = vadd.f32 %v213_v16, %v181_v13  ;;  %v222_v47 = vadd.f32 %v214_v25, %v182_v31  ;;  %v974_v56 = vmul.f32 %v733_v30, %v730_v23  ;;  %v976_v57 = vmul.f32 %v734_v38, %v730_v23  ;;  %1581 = vst [vmem:[#allocation18_spill] sm:$0xff] %v986_v60  ;;  %v1016_v24 = vld [vmem:[%s1517_s2 + $0x7] ss:$0 sm:$0xff]  ;;  %v1021_v25 = vld [vmem:[%s1517_s2 + $0xc] ss:$0 sm:$0xff] }
  0x18   :  { %1577 = vst [vmem:[#allocation14_spill] sm:$0xff] %v968_v54  ;;  %v279_v0 = vmul.f32 %v909_v6, %v943_v32  ;;  %v984_v2 = vmul.f32 %v735_v45, %v730_v23  ;;  %v95_v3 = vadd.f32 %v831_v26, %v87_v39  ;;  %v990_v4 = vmul.f32 %v873_v49, %v191_v8  ;;  %v1029_v31 = vld [vmem:[%s1517_s2 + $0x11] ss:$0 sm:$0xff] }
  0x19   :  { %v243_v51 = vadd.f32 %v235_v1, %v221_v33  ;;  %1578 = vst [vmem:[#allocation15_spill] sm:$0xff] %v976_v57  ;;  %v244_v62 = vadd.f32 %v236_v48, %v222_v47  ;;  %v322_v9 = vmul.f32 %v966_v53, %v817_v19  ;;  %v301_v11 = vmul.f32 %v911_v7, %v956_v40 }
  0x1a   :  { %1580 = vst [vmem:[#allocation17_spill] sm:$0xff] %v984_v2  ;;  %v258_v13 = vmul.f32 %v907_v5, %v943_v32  ;;  %v1003_v16 = vmul.f32 %v798_v14, %v857_v41  ;;  %v1006_v8 = vrot.slane %v978_v58, 6  ;;  %v1009_v22 = vrot.slane %v980_v61, 6  ;;  %1583 = vst [vmem:[#allocation20_spill] sm:$0xff] %v1016_v24 }
  0x1b   :  { %v265_v63 = vadd.f32 %v257_v52, %v243_v51  ;;  %v109_v23 = vmul.f32 %v800_v15, %v857_v41  ;;  %1584 = vst [vmem:[#allocation21_spill] sm:$0xff] %v1021_v25  ;;  %v1024_v29 = vrot.slane %v986_v60, 6  ;;  %v1034_v41 = vld [vmem:[%s1517_s2 + $0x16] ss:$0 sm:$0xff]  ;;  %v280_v1 = vmul.f32 %v909_v6, %v956_v40 }
  0x1c   :  { %1582 = vst [vmem:[#allocation19_spill] sm:$0xff] %v1009_v22  ;;  %v266_v33 = vadd.f32 %v258_v13, %v244_v62  ;;  %v323_v39 = vmul.f32 %v966_v53, %v819_v20  ;;  %v422_v45 = vrot.slane %v817_v19, 1  ;;  %v423_v47 = vrot.slane %v819_v20, 1 }
  0x1d   :  { %v287_v10 = vadd.f32 %v279_v0, %v265_v63  ;;  %1585 = vst [vmem:[#allocation22_spill] sm:$0xff] %v1024_v29  ;;  %v117_v38 = vadd.f32 %v109_v23, %v95_v3  ;;  %v343_v51 = vmul.f32 %v1016_v24, %v819_v20  ;;  %v302_v63 = vmul.f32 %v911_v7, %v997_v12 }
  0x1e   :  { %v288_v52 = vadd.f32 %v280_v1, %v266_v33  ;;  %v364_v62 = vmul.f32 %v1021_v25, %v821_v21  ;;  %v385_v0 = vmul.f32 %v1029_v31, %v850_v36  ;;  %v406_v3 = vmul.f32 %v1034_v41, %v859_v42 }
  0x1f   :  { %v309_v30 = vadd.f32 %v301_v11, %v287_v10  ;;  %v1053_v10 = vrot.slane %v821_v21, 1  ;;  %v1056_v11 = vrot.slane %v850_v36, 1  ;;  %v131_v23 = vmul.f32 %v836_v28, %v869_v46 }
  0x20   :  { %v310_v13 = vadd.f32 %v302_v63, %v288_v52  ;;  %v446_v33 = vmul.f32 %v923_v17, %v422_v45  ;;  %v468_v1 = vmul.f32 %v925_v18, %v423_v47  ;;  %v344_v60 = vmul.f32 %v1016_v24, %v821_v21 }
  0x21   :  { %v330_v48 = vadd.f32 %v322_v9, %v309_v30  ;;  %1586 = vst [vmem:[#allocation23_spill] sm:$0xff] %v1053_v10  ;;  %v1061_v30 = vrot.slane %v859_v42, 1  ;;  %v490_v52 = vmul.f32 %v946_v35, %v1053_v10  ;;  %v550_v63 = vrot.slane %v817_v19, 2 }
  0x22   :  { %v331_v14 = vadd.f32 %v323_v39, %v310_v13  ;;  %v551_v61 = vrot.slane %v819_v20, 2  ;;  %v365_v45 = vmul.f32 %v1021_v25, %v850_v36  ;;  %v175_v39 = vmul.f32 %v863_v44, %v1006_v8 }
  0x23   :  { %v351_v9 = vadd.f32 %v343_v51, %v330_v48  ;;  %v139_v48 = vadd.f32 %v131_v23, %v117_v38  ;;  %v153_v51 = vmul.f32 %v845_v34, %v876_v50  ;;  %v512_v38 = vmul.f32 %v948_v37, %v1056_v11 }
  0x24   :  { %v352_v22 = vadd.f32 %v344_v60, %v331_v14  ;;  %v1085_v19 = vrot.slane %v850_v36, 2  ;;  %v386_v14 = vmul.f32 %v1029_v31, %v859_v42  ;;  %v596_v23 = vmul.f32 %v972_v55, %v551_v61 }
  0x25   :  { %v372_v29 = vadd.f32 %v364_v62, %v351_v9  ;;  %v161_v53 = vadd.f32 %v153_v51, %v139_v48  ;;  %v534_v62 = vmul.f32 %v968_v54, %v1061_v30  ;;  %v1082_v9 = vrot.slane %v821_v21, 2 }
  0x26   :  { %v373_v13 = vadd.f32 %v365_v45, %v352_v22  ;;  %v407_v48 = vmul.f32 %v1034_v41, %v861_v43  ;;  %v447_v22 = vmul.f32 %v923_v17, %v423_v47  ;;  %v469_v47 = vmul.f32 %v925_v18, %v1053_v10 }
  0x27   :  { %v393_v49 = vadd.f32 %v385_v0, %v372_v29  ;;  %v183_v60 = vadd.f32 %v175_v39, %v161_v53  ;;  %v1090_v29 = vrot.slane %v859_v42, 2  ;;  %v574_v0 = vmul.f32 %v970_v27, %v550_v63 }
  0x28   :  { %v394_v25 = vadd.f32 %v386_v14, %v373_v13  ;;  %v618_v53 = vmul.f32 %v974_v56, %v1082_v9  ;;  %v259_v63 = vmul.f32 %v907_v5, %v956_v40  ;;  %v1112_v13 = vrot.slane %v861_v43, 1 }
  0x29   :  { %v414_v20 = vadd.f32 %v406_v3, %v393_v49  ;;  %v223_v24 = vadd.f32 %v990_v4, %v183_v60  ;;  %v237_v49 = vmul.f32 %v892_v59, %v943_v32  ;;  %v1103_v3 = vrot.slane %v978_v58, 7 }
  0x2a   :  { %v415_v39 = vadd.f32 %v407_v48, %v394_v25  ;;  %v96_v4 = vadd.f32 %v831_v26, %v1003_v16  ;;  %1587 = vst [vmem:[#allocation24_spill] sm:$0xff] %v1112_v13  ;;  %v110_v14 = vmul.f32 %v800_v15, %v869_v46  ;;  %v662_v16 = vmul.f32 %v984_v2, %v1090_v29 }
  0x2b   :  { %v454_v51 = vadd.f32 %v446_v33, %v414_v20  ;;  %v245_v33 = vadd.f32 %v237_v49, %v223_v24  ;;  %v640_v20 = vmul.f32 %v976_v57, %v1085_v19  ;;  %v281_v24 = vmul.f32 %v909_v6, %v997_v12 }
  0x2c   :  { %v455_v17 = vadd.f32 %v447_v22, %v415_v39  ;;  %v491_v25 = vmul.f32 %v946_v35, %v1056_v11  ;;  %v118_v48 = vadd.f32 %v110_v14, %v96_v4  ;;  %v513_v22 = vmul.f32 %v948_v37, %v1061_v30 }
  0x2d   :  { %v476_v45 = vadd.f32 %v468_v1, %v454_v51  ;;  %v267_v1 = vadd.f32 %v259_v63, %v245_v33  ;;  %v132_v51 = vmul.f32 %v836_v28, %v876_v50  ;;  %v535_v63 = vmul.f32 %v968_v54, %v1112_v13  ;;  %v1590_v13 = vld [vmem:[#allocation20_spill] sm:$0xff] }
  0x2e   :  { %v477_v18 = vadd.f32 %v469_v47, %v455_v17  ;;  %v154_v39 = vmul.f32 %v845_v34, %v1006_v8  ;;  %v1137_v47 = vrot.slane %v861_v43, 2 }
  0x2f   :  { %v498_v60 = vadd.f32 %v490_v52, %v476_v45  ;;  %v289_v10 = vadd.f32 %v281_v24, %v267_v1  ;;  %v303_v52 = vmul.f32 %v911_v7, %v1103_v3  ;;  %v140_v45 = vadd.f32 %v132_v51, %v118_v48  ;;  %v1589_v24 = vld [vmem:[#allocation19_spill] sm:$0xff] }
  0x30   :  { %v499_v4 = vadd.f32 %v491_v25, %v477_v18  ;;  %v176_v37 = vmul.f32 %v863_v44, %v1589_v24  ;;  %v597_v18 = vmul.f32 %v972_v55, %v1082_v9  ;;  %v1591_v25 = vld [vmem:[#allocation6_spill] sm:$0xff] }
  0x31   :  { %v520_v49 = vadd.f32 %v512_v38, %v498_v60  ;;  %v311_v14 = vadd.f32 %v303_v52, %v289_v10  ;;  %v1588_v38 = vld [vmem:[#allocation13_spill] sm:$0xff]  ;;  %v575_v60 = vmul.f32 %v970_v27, %v551_v61  ;;  %v162_v1 = vadd.f32 %v154_v39, %v140_v45 }
  0x32   :  { %v324_v17 = vmul.f32 %v1588_v38, %v821_v21  ;;  %v521_v48 = vadd.f32 %v513_v22, %v499_v4  ;;  %v619_v21 = vmul.f32 %v974_v56, %v1085_v19  ;;  %v216_v61 = vmul.f32 %v1591_v25, %v943_v32 }
  0x33   :  { %v542_v33 = vadd.f32 %v534_v62, %v520_v49  ;;  %v345_v62 = vmul.f32 %v1590_v13, %v850_v36  ;;  %v184_v10 = vadd.f32 %v176_v37, %v162_v1  ;;  %v641_v39 = vmul.f32 %v976_v57, %v1090_v29 }
  0x34   :  { %v332_v51 = vadd.f32 %v324_v17, %v311_v14  ;;  %v543_v52 = vadd.f32 %v535_v63, %v521_v48  ;;  %v238_v14 = vmul.f32 %v892_v59, %v956_v40  ;;  %v387_v32 = vmul.f32 %v1029_v31, %v861_v43 }
  0x35   :  { %v582_v54 = vadd.f32 %v574_v0, %v542_v33  ;;  %v1592_v0 = vld [vmem:[#allocation21_spill] sm:$0xff]  ;;  %v663_v33 = vmul.f32 %v984_v2, %v1137_v47  ;;  %v224_v4 = vadd.f32 %v216_v61, %v184_v10  ;;  %v260_v48 = vmul.f32 %v907_v5, %v997_v12 }
  0x36   :  { %v353_v45 = vadd.f32 %v345_v62, %v332_v51  ;;  %v366_v22 = vmul.f32 %v1592_v0, %v859_v42  ;;  %v583_v17 = vadd.f32 %v575_v60, %v543_v52  ;;  %v1594_v51 = vld [vmem:[#allocation3_spill] sm:$0xff]  ;;  %v282_v52 = vmul.f32 %v909_v6, %v1103_v3 }
  0x37   :  { %v604_v49 = vadd.f32 %v596_v23, %v582_v54  ;;  %v1593_v54 = vld [vmem:[#allocation16_spill] sm:$0xff]  ;;  %v246_v63 = vadd.f32 %v238_v14, %v224_v4  ;;  %v89_v62 = vmul.f32 %v1594_v51, %v869_v46  ;;  %v678_v60 = vld [vmem:[%s1519_s1] sm:$0xff]  ;;  %v1596_v14 = vld [vmem:[#allocation9_spill] sm:$0xff] }
  0x38   :  { %v374_v1 = vadd.f32 %v366_v22, %v353_v45  ;;  %v1161_v23 = vrot.slane %v1593_v54, 7  ;;  %v605_v61 = vadd.f32 %v597_v18, %v583_v17  ;;  %v111_v22 = vmul.f32 %v800_v15, %v876_v50  ;;  %v1595_v4 = vld [vmem:[#allocation23_spill] sm:$0xff] }
  0x39   :  { %v626_v37 = vadd.f32 %v618_v53, %v604_v49  ;;  %v408_v53 = vmul.f32 %v1034_v41, %v978_v58  ;;  %v268_v49 = vadd.f32 %v260_v48, %v246_v63  ;;  %v97_v45 = vadd.f32 %v831_v26, %v89_v62  ;;  %v1597_v26 = vld [vmem:[#allocation10_spill] sm:$0xff] }
  0x3a   :  { %v395_v2 = vadd.f32 %v387_v32, %v374_v1  ;;  %v304_v1 = vmul.f32 %v911_v7, %v1161_v23  ;;  %v133_v63 = vmul.f32 %v836_v28, %v1006_v8  ;;  %v470_v15 = vmul.f32 %v1597_v26, %v1056_v11 }
  0x3b   :  { %v648_v10 = vadd.f32 %v640_v20, %v626_v37  ;;  %v627_v20 = vadd.f32 %v619_v21, %v605_v61  ;;  %v448_v37 = vmul.f32 %v1596_v14, %v1595_v4  ;;  %v290_v17 = vadd.f32 %v282_v52, %v268_v49  ;;  %v1599_v4 = vld [vmem:[#allocation24_spill] sm:$0xff] }
  0x3c   :  { %v416_v18 = vadd.f32 %v408_v53, %v395_v2  ;;  %v119_v32 = vadd.f32 %v111_v22, %v97_v45  ;;  %v679_v2 = vld [vmem:[%s1519_s1 + $0x8] sm:$0xff]  ;;  %v325_v21 = vmul.f32 %v1588_v38, %v850_v36  ;;  %v155_v61 = vmul.f32 %v845_v34, %v1589_v24  ;;  %v1598_v22 = vld [vmem:[#allocation22_spill] sm:$0xff] }
  0x3d   :  { %v670_v46 = vadd.f32 %v662_v16, %v648_v10  ;;  %v649_v6 = vadd.f32 %v641_v39, %v627_v20  ;;  %v312_v16 = vadd.f32 %v304_v1, %v290_v17  ;;  %v1197_v53 = vrot.slane %v978_v58, 1 }
  0x3e   :  { %v456_v62 = vadd.f32 %v448_v37, %v416_v18  ;;  %v141_v10 = vadd.f32 %v133_v63, %v119_v32  ;;  %v492_v49 = vmul.f32 %v946_v35, %v1061_v30  ;;  %v346_v36 = vmul.f32 %v1590_v13, %v859_v42  ;;  %v1600_v37 = vld [vmem:[#allocation12_spill] sm:$0xff]  ;;  %v1601_v63 = vld [vmem:[#allocation14_spill] sm:$0xff] }
  0x3f   :  { %v686_v48 = vmul.f32 %v678_v60, %v670_v46  ;;  %v671_v39 = vadd.f32 %v663_v33, %v649_v6  ;;  %v333_v52 = vadd.f32 %v325_v21, %v312_v16  ;;  %v177_v46 = vmul.f32 %v863_v44, %v1598_v22 }
  0x40   :  { %v478_v60 = vadd.f32 %v470_v15, %v456_v62  ;;  %v163_v45 = vadd.f32 %v155_v61, %v141_v10  ;;  %v514_v6 = vmul.f32 %v1600_v37, %v1599_v4  ;;  %v367_v15 = vmul.f32 %v1592_v0, %v861_v43 }
  0x41   :  { %694 = vst.msk [vmem:[%s1520_s4] sm:$0xff] %vm17_vm0, %v686_v48  ;;  %v687_v20 = vmul.f32 %v679_v2, %v671_v39  ;;  %v354_v33 = vadd.f32 %v346_v36, %v333_v52  ;;  %v217_v1 = vmul.f32 %v1591_v25, %v956_v40  ;;  %v536_v48 = vmul.f32 %v1601_v63, %v1197_v53  ;;  %v1602_v52 = vld [vmem:[#allocation18_spill] sm:$0xff] }
  0x42   :  { %v500_v18 = vadd.f32 %v492_v49, %v478_v60  ;;  %v185_v17 = vadd.f32 %v177_v46, %v163_v45  ;;  %v1218_v62 = vrot.slane %v978_v58, 2  ;;  %v388_v16 = vmul.f32 %v1029_v31, %v978_v58 }
  0x43   :  { %695 = vst.msk [vmem:[%s1520_s4 + $0x8] sm:$0xff] %vm17_vm0, %v687_v20  ;;  %v375_v2 = vadd.f32 %v367_v15, %v354_v33  ;;  %v239_v40 = vmul.f32 %v892_v59, %v997_v12  ;;  %v576_v61 = vmul.f32 %v970_v27, %v1082_v9  ;;  %v598_v39 = vmul.f32 %v972_v55, %v1085_v19 }
  0x44   :  { %v522_v32 = vadd.f32 %v514_v6, %v500_v18  ;;  %v225_v21 = vadd.f32 %v217_v1, %v185_v17  ;;  %v409_v60 = vmul.f32 %v1034_v41, %v1593_v54  ;;  %v1231_v36 = vrot.slane %v1602_v52, 7  ;;  %v1603_v1 = vld [vmem:[#allocation7_spill] sm:$0xff] }
  0x45   :  { %v396_v49 = vadd.f32 %v388_v16, %v375_v2  ;;  %v261_v46 = vmul.f32 %v907_v5, %v1103_v3  ;;  %v620_v18 = vmul.f32 %v974_v56, %v1090_v29  ;;  %v642_v9 = vmul.f32 %v976_v57, %v1137_v47 }
  0x46   :  { %v544_v10 = vadd.f32 %v536_v48, %v522_v32  ;;  %v247_v45 = vadd.f32 %v239_v40, %v225_v21  ;;  %v90_v6 = vmul.f32 %v1594_v51, %v876_v50  ;;  %v449_v15 = vmul.f32 %v1596_v14, %v1056_v11  ;;  %v1245_v48 = vld [vmem:[#allocation2 + $0x48] sm:$0xff]  ;;  %v1604_v21 = vld [vmem:[#allocation5_spill] sm:$0xff] }
  0x47   :  { %v417_v33 = vadd.f32 %v409_v60, %v396_v49  ;;  %v283_v32 = vmul.f32 %v1603_v1, %v1161_v23  ;;  %v1248_v16 = vrot.slane %v1593_v54, 1  ;;  %v471_v60 = vmul.f32 %v1597_v26, %v1061_v30 }
  0x48   :  { %v584_v20 = vadd.f32 %v576_v61, %v544_v10  ;;  %v269_v17 = vadd.f32 %v261_v46, %v247_v45  ;;  %v98_v40 = vadd.f32 %v1604_v21, %v90_v6  ;;  %v1605_v10 = vld [vmem:[#allocation4_spill] sm:$0xff]  ;;  %v305_v49 = vmul.f32 %v911_v7, %v1231_v36 }
  0x49   :  { %v112_v61 = vmul.f32 %v1605_v10, %v1006_v8  ;;  %v457_v50 = vadd.f32 %v449_v15, %v417_v33  ;;  %v1258_v46 = vrot.slane %v1245_v48, 6  ;;  %v493_v10 = vmul.f32 %v946_v35, %v1599_v4 }
  0x4a   :  { %v606_v2 = vadd.f32 %v598_v39, %v584_v20  ;;  %v291_v11 = vadd.f32 %v283_v32, %v269_v17  ;;  %v134_v20 = vmul.f32 %v836_v28, %v1589_v24  ;;  %v326_v15 = vmul.f32 %v1588_v38, %v859_v42  ;;  %v1606_v32 = vld [vmem:[#allocation17_spill] sm:$0xff] }
  0x4b   :  { %v120_v39 = vadd.f32 %v112_v61, %v98_v40  ;;  %v479_v6 = vadd.f32 %v471_v60, %v457_v50  ;;  %v664_v7 = vmul.f32 %v1606_v32, %v1218_v62  ;;  %v680_v40 = vld [vmem:[%s1519_s1 + $0x10] sm:$0xff]  ;;  %v515_v50 = vmul.f32 %v1600_v37, %v1197_v53 }
  0x4c   :  { %v628_v45 = vadd.f32 %v620_v18, %v606_v2  ;;  %v313_v33 = vadd.f32 %v305_v49, %v291_v11  ;;  %v156_v2 = vmul.f32 %v845_v34, %v1598_v22  ;;  %v347_v42 = vmul.f32 %v1590_v13, %v861_v43 }
  0x4d   :  { %v142_v18 = vadd.f32 %v134_v20, %v120_v39  ;;  %v501_v61 = vadd.f32 %v493_v10, %v479_v6  ;;  %v178_v49 = vmul.f32 %v863_v44, %v1258_v46  ;;  %v537_v39 = vmul.f32 %v1601_v63, %v1248_v16 }
  0x4e   :  { %v650_v17 = vadd.f32 %v642_v9, %v628_v45  ;;  %v334_v60 = vadd.f32 %v326_v15, %v313_v33  ;;  %v368_v10 = vmul.f32 %v1592_v0, %v978_v58  ;;  %v1284_v37 = vrot.slane %v1593_v54, 2 }
  0x4f   :  { %v164_v11 = vadd.f32 %v156_v2, %v142_v18  ;;  %v523_v45 = vadd.f32 %v515_v50, %v501_v61  ;;  %v389_v2 = vmul.f32 %v1029_v31, %v1593_v54  ;;  %v621_v61 = vmul.f32 %v974_v56, %v1137_v47 }
  0x50   :  { %v672_v9 = vadd.f32 %v664_v7, %v650_v17  ;;  %v355_v20 = vadd.f32 %v347_v42, %v334_v60  ;;  %v218_v7 = vmul.f32 %v1591_v25, %v997_v12  ;;  %v577_v17 = vmul.f32 %v970_v27, %v1085_v19 }
  0x51   :  { %v186_v33 = vadd.f32 %v178_v49, %v164_v11  ;;  %v545_v15 = vadd.f32 %v537_v39, %v523_v45  ;;  %v240_v50 = vmul.f32 %v892_v59, %v1103_v3  ;;  %v410_v42 = vmul.f32 %v1034_v41, %v1602_v52 }
  0x52   :  { %v688_v6 = vmul.f32 %v680_v40, %v672_v9  ;;  %v376_v18 = vadd.f32 %v368_v10, %v355_v20  ;;  %v599_v40 = vmul.f32 %v972_v55, %v1090_v29  ;;  %v1305_v9 = vrot.slane %v1245_v48, 7 }
  0x53   :  { %v226_v12 = vadd.f32 %v218_v7, %v186_v33  ;;  %v585_v19 = vadd.f32 %v577_v17, %v545_v15  ;;  %v643_v11 = vmul.f32 %v976_v57, %v1218_v62  ;;  %v262_v45 = vmul.f32 %v907_v5, %v1161_v23  ;;  %v1318_v7 = vld [vmem:[#allocation2 + $0x50] sm:$0xff] }
  0x54   :  { %696 = vst.msk [vmem:[%s1520_s4 + $0x10] sm:$0xff] %vm17_vm0, %v688_v6  ;;  %v397_v60 = vadd.f32 %v389_v2, %v376_v18  ;;  %v91_v39 = vmul.f32 %v1594_v51, %v1006_v8  ;;  %v1314_v6 = vrot.slane %v1602_v52, 1  ;;  %v450_v33 = vmul.f32 %v1596_v14, %v1061_v30  ;;  %v1607_v2 = vld [vmem:[#allocation4_spill] sm:$0xff] }
  0x55   :  { %v248_v49 = vadd.f32 %v240_v50, %v226_v12  ;;  %v607_v20 = vadd.f32 %v599_v40, %v585_v19  ;;  %v284_v17 = vmul.f32 %v1603_v1, %v1231_v36  ;;  %v113_v12 = vmul.f32 %v1607_v2, %v1589_v24  ;;  %v1608_v19 = vld [vmem:[#allocation8_spill] sm:$0xff] }
  0x56   :  { %v418_v10 = vadd.f32 %v410_v42, %v397_v60  ;;  %v99_v18 = vadd.f32 %v1604_v21, %v91_v39  ;;  %v472_v50 = vmul.f32 %v1597_v26, %v1599_v4  ;;  %v306_v60 = vmul.f32 %v1608_v19, %v1305_v9 }
  0x57   :  { %v270_v15 = vadd.f32 %v262_v45, %v248_v49  ;;  %v629_v8 = vadd.f32 %v621_v61, %v607_v20  ;;  %v71_v42 = vrot.slane %v1318_v7, 6  ;;  %v135_v45 = vmul.f32 %v836_v28, %v1598_v22  ;;  %v681_v20 = vld [vmem:[%s1519_s1 + $0x18] sm:$0xff] }
  0x58   :  { %v458_v40 = vadd.f32 %v450_v33, %v418_v10  ;;  %v121_v49 = vadd.f32 %v113_v12, %v99_v18  ;;  %v665_v39 = vmul.f32 %v1606_v32, %v1284_v37  ;;  %v494_v61 = vmul.f32 %v946_v35, %v1197_v53  ;;  %v1609_v12 = vld [vmem:[#allocation12_spill] sm:$0xff] }
  0x59   :  { %v292_v30 = vadd.f32 %v284_v17, %v270_v15  ;;  %v651_v1 = vadd.f32 %v643_v11, %v629_v8  ;;  %v327_v33 = vmul.f32 %v1588_v38, %v861_v43  ;;  %v157_v17 = vmul.f32 %v845_v34, %v1258_v46 }
  0x5a   :  { %v480_v21 = vadd.f32 %v472_v50, %v458_v40  ;;  %v143_v15 = vadd.f32 %v135_v45, %v121_v49  ;;  %v516_v8 = vmul.f32 %v1609_v12, %v1248_v16  ;;  %v538_v40 = vmul.f32 %v1601_v63, %v1314_v6 }
  0x5b   :  { %v314_v10 = vadd.f32 %v306_v60, %v292_v30  ;;  %v673_v11 = vadd.f32 %v665_v39, %v651_v1  ;;  %v348_v35 = vmul.f32 %v1590_v13, %v978_v58  ;;  %v179_v30 = vmul.f32 %v863_v44, %v71_v42 }
  0x5c   :  { %v502_v18 = vadd.f32 %v494_v61, %v480_v21  ;;  %v165_v60 = vadd.f32 %v157_v17, %v143_v15  ;;  %v1351_v45 = vrot.slane %v1602_v52, 2  ;;  %v578_v1 = vmul.f32 %v970_v27, %v1090_v29 }
  0x5d   :  { %v335_v50 = vadd.f32 %v327_v33, %v314_v10  ;;  %v689_v43 = vmul.f32 %v681_v20, %v673_v11  ;;  %v369_v39 = vmul.f32 %v1592_v0, %v1593_v54  ;;  %v219_v10 = vmul.f32 %v1591_v25, %v1103_v3 }
  0x5e   :  { %v524_v49 = vadd.f32 %v516_v8, %v502_v18  ;;  %v187_v61 = vadd.f32 %v179_v30, %v165_v60  ;;  %v600_v33 = vmul.f32 %v972_v55, %v1137_v47  ;;  %v622_v29 = vmul.f32 %v974_v56, %v1218_v62  ;;  %v1373_v18 = vld [vmem:[#allocation2 + $0x58] sm:$0xff] }
  0x5f   :  { %v356_v21 = vadd.f32 %v348_v35, %v335_v50  ;;  %697 = vst.msk [vmem:[%s1520_s4 + $0x18] sm:$0xff] %vm17_vm0, %v689_v43  ;;  %v644_v35 = vmul.f32 %v976_v57, %v1284_v37  ;;  %v390_v17 = vmul.f32 %v1029_v31, %v1602_v52  ;;  %v241_v11 = vmul.f32 %v892_v59, %v1161_v23 }
  0x60   :  { %v546_v20 = vadd.f32 %v538_v40, %v524_v49  ;;  %v227_v3 = vadd.f32 %v219_v10, %v187_v61  ;;  %v411_v40 = vmul.f32 %v1034_v41, %v1245_v48  ;;  %v451_v50 = vmul.f32 %v1596_v14, %v1599_v4  ;;  %v1610_v61 = vld [vmem:[#allocation7_spill] sm:$0xff]  ;;  %v1611_v14 = vld [vmem:[#allocation5_spill] sm:$0xff] }
  0x61   :  { %v377_v15 = vadd.f32 %v369_v39, %v356_v21  ;;  %v199_v60 = vrot.slane %v1318_v7, 7  ;;  %v263_v49 = vmul.f32 %v907_v5, %v1231_v36  ;;  %v92_v21 = vmul.f32 %v1594_v51, %v1589_v24 }
  0x62   :  { %v586_v8 = vadd.f32 %v578_v1, %v546_v20  ;;  %v249_v43 = vadd.f32 %v241_v11, %v227_v3  ;;  %v285_v1 = vmul.f32 %v1610_v61, %v1305_v9  ;;  %v72_v10 = vrot.slane %v1373_v18, 6 }
  0x63   :  { %v398_v30 = vadd.f32 %v390_v17, %v377_v15  ;;  %v114_v20 = vmul.f32 %v1607_v2, %v1598_v22  ;;  %v100_v15 = vadd.f32 %v1611_v14, %v92_v21  ;;  %v136_v17 = vmul.f32 %v836_v28, %v1258_v46  ;;  %v1612_v28 = vld [vmem:[#allocation11_spill] sm:$0xff] }
  0x64   :  { %v608_v39 = vadd.f32 %v600_v33, %v586_v8  ;;  %v271_v57 = vadd.f32 %v263_v49, %v249_v43  ;;  %v666_v24 = vmul.f32 %v1606_v32, %v1351_v45  ;;  %v473_v51 = vmul.f32 %v1597_v26, %v1197_v53 }
  0x65   :  { %v419_v4 = vadd.f32 %v411_v40, %v398_v30  ;;  %v158_v33 = vmul.f32 %v845_v34, %v71_v42  ;;  %v307_v22 = vmul.f32 %v1608_v19, %v199_v60  ;;  %v122_v2 = vadd.f32 %v114_v20, %v100_v15  ;;  %v682_v30 = vld [vmem:[%s1519_s1 + $0x20] sm:$0xff] }
  0x66   :  { %v630_v3 = vadd.f32 %v622_v29, %v608_v39  ;;  %v293_v8 = vadd.f32 %v285_v1, %v271_v57  ;;  %v1399_v14 = vrot.slane %v1245_v48, 1  ;;  %v495_v46 = vmul.f32 %v1612_v28, %v1248_v16 }
  0x67   :  { %v459_v11 = vadd.f32 %v451_v50, %v419_v4  ;;  %v328_v29 = vmul.f32 %v1588_v38, %v978_v58  ;;  %v144_v57 = vadd.f32 %v136_v17, %v122_v2  ;;  %v180_v50 = vmul.f32 %v863_v44, %v72_v10 }
  0x68   :  { %v652_v40 = vadd.f32 %v644_v35, %v630_v3  ;;  %v315_v42 = vadd.f32 %v307_v22, %v293_v8  ;;  %v517_v35 = vmul.f32 %v1609_v12, %v1314_v6  ;;  %v349_v39 = vmul.f32 %v1590_v13, %v1593_v54 }
  0x69   :  { %v481_v34 = vadd.f32 %v473_v51, %v459_v11  ;;  %v166_v1 = vadd.f32 %v158_v33, %v144_v57  ;;  %v539_v20 = vmul.f32 %v1601_v63, %v1399_v14  ;;  %v370_v4 = vmul.f32 %v1592_v0, %v1602_v52 }
  0x6a   :  { %v674_v43 = vadd.f32 %v666_v24, %v652_v40  ;;  %v336_v21 = vadd.f32 %v328_v29, %v315_v42  ;;  %v220_v10 = vmul.f32 %v1591_v25, %v1161_v23  ;;  %v579_v3 = vmul.f32 %v970_v27, %v1137_v47  ;;  %v1613_v42 = vld [vmem:[#allocation9_spill] sm:$0xff] }
  0x6b   :  { %v503_v49 = vadd.f32 %v495_v46, %v481_v34  ;;  %v188_v44 = vadd.f32 %v180_v50, %v166_v1  ;;  %v391_v24 = vmul.f32 %v1029_v31, %v1245_v48  ;;  %v242_v8 = vmul.f32 %v892_v59, %v1231_v36 }
  0x6c   :  { %v690_v58 = vmul.f32 %v682_v30, %v674_v43  ;;  %v357_v17 = vadd.f32 %v349_v39, %v336_v21  ;;  %v601_v25 = vmul.f32 %v972_v55, %v1218_v62  ;;  %v412_v23 = vmul.f32 %v1034_v41, %v1318_v7  ;;  %v1614_v43 = vld [vmem:[#allocation15_spill] sm:$0xff] }
  0x6d   :  { %v525_v15 = vadd.f32 %v517_v35, %v503_v49  ;;  %v228_v11 = vadd.f32 %v220_v10, %v188_v44  ;;  %v200_v22 = vrot.slane %v1373_v18, 7  ;;  %v264_v46 = vmul.f32 %v907_v5, %v1305_v9 }
  0x6e   :  { %698 = vst.msk [vmem:[%s1520_s4 + $0x20] sm:$0xff] %vm17_vm0, %v690_v58  ;;  %v378_v33 = vadd.f32 %v370_v4, %v357_v17  ;;  %v1437_v29 = vrot.slane %v1245_v48, 2  ;;  %v623_v59 = vmul.f32 %v974_v56, %v1284_v37  ;;  %v286_v36 = vmul.f32 %v1610_v61, %v199_v60 }
  0x6f   :  { %v547_v51 = vadd.f32 %v539_v20, %v525_v15  ;;  %v250_v47 = vadd.f32 %v242_v8, %v228_v11  ;;  %v452_v57 = vmul.f32 %v1613_v42, %v1197_v53  ;;  %v645_v35 = vmul.f32 %v1614_v43, %v1351_v45  ;;  %v683_v15 = vld [vmem:[%s1519_s1 + $0x28] sm:$0xff] }
  0x70   :  { %v399_v40 = vadd.f32 %v391_v24, %v378_v33  ;;  %v474_v5 = vmul.f32 %v1597_v26, %v1248_v16  ;;  %v308_v39 = vmul.f32 %v1608_v19, %v200_v22  ;;  %v667_v60 = vmul.f32 %v1606_v32, %v1437_v29 }
  0x71   :  { %v587_v2 = vadd.f32 %v579_v3, %v547_v51  ;;  %v272_v50 = vadd.f32 %v264_v46, %v250_v47  ;;  %v432_v61 = vrot.slane %v1318_v7, 1  ;;  %v496_v53 = vmul.f32 %v1612_v28, %v1314_v6 }
  0x72   :  { %v420_v34 = vadd.f32 %v412_v23, %v399_v40  ;;  %v329_v4 = vmul.f32 %v1588_v38, %v1593_v54  ;;  %v518_v19 = vmul.f32 %v1609_v12, %v1399_v14  ;;  %v350_v3 = vmul.f32 %v1590_v13, %v1602_v52 }
  0x73   :  { %v609_v30 = vadd.f32 %v601_v25, %v587_v2  ;;  %v294_v21 = vadd.f32 %v286_v36, %v272_v50  ;;  %v540_v24 = vmul.f32 %v1601_v63, %v432_v61  ;;  %v371_v38 = vmul.f32 %v1592_v0, %v1245_v48 }
  0x74   :  { %v460_v49 = vadd.f32 %v452_v57, %v420_v34  ;;  %v392_v54 = vmul.f32 %v1029_v31, %v1318_v7  ;;  %v580_v13 = vmul.f32 %v970_v27, %v1218_v62  ;;  %v602_v23 = vmul.f32 %v972_v55, %v1284_v37 }
  0x75   :  { %v631_v9 = vadd.f32 %v623_v59, %v609_v30  ;;  %v316_v20 = vadd.f32 %v308_v39, %v294_v21  ;;  %v413_v0 = vmul.f32 %v1034_v41, %v1373_v18  ;;  %v560_v48 = vrot.slane %v1318_v7, 2 }
  0x76   :  { %v482_v58 = vadd.f32 %v474_v5, %v460_v49  ;;  %v624_v40 = vmul.f32 %v974_v56, %v1351_v45  ;;  %v453_v47 = vmul.f32 %v1613_v42, %v1248_v16  ;;  %v646_v46 = vmul.f32 %v1614_v43, %v1437_v29  ;;  %v684_v16 = vld [vmem:[%s1519_s1 + $0x30] sm:$0xff] }
  0x77   :  { %v653_v1 = vadd.f32 %v645_v35, %v631_v9  ;;  %v337_v10 = vadd.f32 %v329_v4, %v316_v20  ;;  %v475_v36 = vmul.f32 %v1597_v26, %v1314_v6  ;;  %v668_v41 = vmul.f32 %v1606_v32, %v560_v48 }
  0x78   :  { %v504_v44 = vadd.f32 %v496_v53, %v482_v58  ;;  %v433_v7 = vrot.slane %v1373_v18, 1  ;;  %v497_v57 = vmul.f32 %v1612_v28, %v1399_v14  ;;  %v519_v35 = vmul.f32 %v1609_v12, %v432_v61 }
  0x79   :  { %v675_v17 = vadd.f32 %v667_v60, %v653_v1  ;;  %v358_v11 = vadd.f32 %v350_v3, %v337_v10  ;;  %v581_v14 = vmul.f32 %v970_v27, %v1284_v37  ;;  %v603_v49 = vmul.f32 %v972_v55, %v1351_v45  ;;  %v685_v27 = vld [vmem:[%s1519_s1 + $0x38] sm:$0xff] }
  0x7a   :  { %v526_v33 = vadd.f32 %v518_v19, %v504_v44  ;;  %v541_v26 = vmul.f32 %v1601_v63, %v433_v7  ;;  %v561_v21 = vrot.slane %v1373_v18, 2  ;;  %v625_v39 = vmul.f32 %v974_v56, %v1437_v29 }
  0x7b   :  { %v691_v51 = vmul.f32 %v683_v15, %v675_v17  ;;  %v379_v52 = vadd.f32 %v371_v38, %v358_v11  ;;  %v647_v60 = vmul.f32 %v1614_v43, %v560_v48 }
  0x7c   :  { %v548_v8 = vadd.f32 %v540_v24, %v526_v33  ;;  %v669_v53 = vmul.f32 %v1606_v32, %v561_v21 }
  0x7d   :  { %699 = vst.msk [vmem:[%s1520_s4 + $0x28] sm:$0xff] %vm17_vm0, %v691_v51  ;;  %v400_v22 = vadd.f32 %v392_v54, %v379_v52 }
  0x7e   :  { %v588_v25 = vadd.f32 %v580_v13, %v548_v8 }
  0x7f   :  { %v421_v31 = vadd.f32 %v413_v0, %v400_v22 }
  0x80   :  { %v610_v2 = vadd.f32 %v602_v23, %v588_v25 }
  0x81   :  { %v461_v59 = vadd.f32 %v453_v47, %v421_v31 }
  0x82   :  { %v632_v62 = vadd.f32 %v624_v40, %v610_v2 }
  0x83   :  { %v483_v34 = vadd.f32 %v475_v36, %v461_v59 }
  0x84   :  { %v654_v30 = vadd.f32 %v646_v46, %v632_v62 }
  0x85   :  { %v505_v50 = vadd.f32 %v497_v57, %v483_v34 }
  0x86   :  { %v676_v42 = vadd.f32 %v668_v41, %v654_v30 }
  0x87   :  { %v527_v9 = vadd.f32 %v519_v35, %v505_v50 }
  0x88   :  { %v692_v5 = vmul.f32 %v684_v16, %v676_v42 }
  0x89   :  { %v549_v6 = vadd.f32 %v541_v26, %v527_v9 }
  0x8a   :  { %700 = vst.msk [vmem:[%s1520_s4 + $0x30] sm:$0xff] %vm17_vm0, %v692_v5 }
  0x8b   :  { %v589_v28 = vadd.f32 %v581_v14, %v549_v6 }
  0x8d   :  { %v611_v12 = vadd.f32 %v603_v49, %v589_v28 }
  0x8f   :  { %v633_v63 = vadd.f32 %v625_v39, %v611_v12 }
  0x91   :  { %v655_v61 = vadd.f32 %v647_v60, %v633_v63 }
  0x93   :  { %v677_v37 = vadd.f32 %v669_v53, %v655_v61 }
  0x95   :  { %v693_v1 = vmul.f32 %v685_v27, %v677_v37 }
  0x97   :  { %701 = vst.msk [vmem:[%s1520_s4 + $0x38] sm:$0xff] %vm17_vm0, %v693_v1 }

</bundles_post_ra>
